<compile_context>
chip_gen: v5e
topology: v5e:2x2
jax: 0.10.0
libtpu: 0.0.40
codegen_flags: <defaults>
</compile_context>

<pallas_src>
import numpy as np
import jax
import jax.numpy as jnp
from jax.experimental import pallas as pl
from jax.experimental.pallas import tpu as pltpu


# ---------------------------------------------------------------------------
# Host-side (trace-time) constant builders
# ---------------------------------------------------------------------------
def _scatter_mat(H, W):
    """Stacked (4*H*W, 4*H*W) 0/1 scatter for ConvTranspose2d(k=2, s=2).

    Row k*HW + (i*W + j), k = kh*2 + kw, has a single 1 at column
    (2i+kh)*(2W) + (2j+kw).  Exact in bf16 (entries are 0/1).
    """
    HW, W2 = H * W, 2 * W
    P = np.zeros((4, HW, 4 * HW), np.float32)
    ij = np.arange(HW)
    i, j = ij // W, ij % W
    for kh in range(2):
        for kw in range(2):
            P[kh * 2 + kw, ij, (2 * i + kh) * W2 + (2 * j + kw)] = 1.0
    return jnp.asarray(P.reshape(4 * HW, 4 * HW), dtype=jnp.bfloat16)


def _tap_masks(H, W):
    """(9, 1, H*W) 0/1 masks: validity of 3x3 tap (dh, dw) at each output pixel
    (zero padding -> taps whose source pixel falls outside the image are masked)."""
    HW = H * W
    p = np.arange(HW)
    y, x = p // W, p % W
    m = np.zeros((9, 1, HW), np.float32)
    for dh in range(3):
        for dw in range(3):
            sy, sx = y + dh - 1, x + dw - 1
            m[dh * 3 + dw, 0] = ((sy >= 0) & (sy < H) & (sx >= 0) & (sx < W))
    return jnp.asarray(m)


def _num_tensorcores():
    """v7x has 2 TensorCores/chip; v5e/v6e have 1.  Used only to size the grid."""
    try:
        kind = jax.devices()[0].device_kind.lower()
        return 2 if "v7" in kind else 1
    except Exception:
        return 1


# ---------------------------------------------------------------------------
# Fused Pallas kernel (closure over static shapes)
# ---------------------------------------------------------------------------
def _make_kernel(SB, Ci, Co, H, W):
    H2, W2 = 2 * H, 2 * W
    HW, HW2 = H * W, H2 * W2
    f32, bf16 = jnp.float32, jnp.bfloat16

    def mm(a, b):  # bf16 operands, f32 accumulation on the MXU
        return jnp.dot(a, b, preferred_element_type=f32)

    def kernel(x_ref, skip_ref, upw_ref, upb_ref, pmat_ref, mask_ref,
               w1_ref, w2_ref, wid_ref, idb_ref, out_ref):

        def conv3x3(w_stacked, act_b):
            # One fat channel-mix matmul for all 9 taps: (9*Co, C) @ (C, HW2).
            t_all = mm(w_stacked, act_b)
            acc = jnp.zeros((Co, HW2), f32)
            for k in range(9):                       # static unroll
                dh, dw = k // 3, k % 3
                off = (dh - 1) * W2 + (dw - 1)       # flat source offset of this tap
                t_k = t_all[k * Co:(k + 1) * Co, :]  # static sublane slice
                if off == 0:
                    acc = acc + t_k                  # center tap: full mask, no shift
                else:
                    rolled = pltpu.roll(t_k, shift=(-off) % HW2, axis=1)  # XLU
                    acc = acc + rolled * mask_ref[k]                      # zero-pad mask
            return acc

        def inorm_relu(h):
            # InstanceNorm2d(affine=False, eps=1e-5) + ReLU.
            # Fused lane reduction: one pass over [h ; h*h] stacked on sublanes.
            s = jnp.sum(jnp.concatenate([h, h * h], axis=0), axis=1, keepdims=True)
            mean = s[:Co] * (1.0 / HW2)
            ex2 = s[Co:] * (1.0 / HW2)
            var = jnp.maximum(ex2 - mean * mean, 0.0)   # clamp one-pass cancellation
            return jnp.maximum((h - mean) * jax.lax.rsqrt(var + 1e-5), 0.0)

        for b in range(SB):                              # static per-block sample loop
            x = x_ref[b]                                  # (Ci, HW)   bf16
            sk = skip_ref[b]                              # (Co, HW2)  bf16

            # 1) ConvTranspose2d(Ci, Ci, k=2, s=2):
            #    one stacked channel-mix matmul, then one 0/1 scatter matmul.
            v_all = mm(upw_ref[...], x)                   # (4*Ci, HW) f32
            v_cat = jnp.concatenate(
                [v_all[k * Ci:(k + 1) * Ci, :] for k in range(4)], axis=1
            ).astype(bf16)                                # (Ci, 4*HW) bf16
            up = mm(v_cat, pmat_ref[...]) + upb_ref[...]  # (Ci, HW2)  f32

            # 2) concat [up ; skip] along channels (sublanes) -- materialized once.
            cat_b = jnp.concatenate([up.astype(bf16), sk], axis=0)   # (Ci+Co, HW2)

            # 3) ResBlock main path + identity + residual ReLU.
            h = inorm_relu(conv3x3(w1_ref[...], cat_b))
            h = inorm_relu(conv3x3(w2_ref[...], h.astype(bf16)))
            res = mm(wid_ref[...], cat_b) + idb_ref[...]
            out_ref[b] = jnp.maximum(h + res, 0.0).astype(out_ref.dtype)

    return kernel


# ---------------------------------------------------------------------------
# Wrapper: NCHW in / NCHW out, single pallas_call
# ---------------------------------------------------------------------------
def upsample_conv_forward(x_nchw, skip_nchw, params):
    N, Ci, H, W = x_nchw.shape
    Co = params["conv1_w"].shape[0]
    Ct = Ci + Co
    H2, W2 = 2 * H, 2 * W
    HW, HW2 = H * W, H2 * W2
    bf16 = jnp.bfloat16

    # Activations: channels-first, flat spatial, bf16 (halves input DMA bytes).
    x3 = x_nchw.reshape(N, Ci, HW).astype(bf16)
    sk3 = skip_nchw.reshape(N, Co, HW2).astype(bf16)

    # Weight reorg (tiny, trace-time).  Taps stacked along the output-row axis.
    upw_s = jnp.transpose(params["up_w"], (2, 3, 1, 0)).reshape(4 * Ci, Ci).astype(bf16)
    upb = params["up_b"].reshape(Ci, 1).astype(jnp.float32)
    w1_s = jnp.transpose(params["conv1_w"], (2, 3, 0, 1)).reshape(9 * Co, Ct).astype(bf16)
    w2_s = jnp.transpose(params["conv2_w"], (2, 3, 0, 1)).reshape(9 * Co, Co).astype(bf16)
    wid = params["id_w"][:, :, 0, 0].astype(bf16)
    idb = params["id_b"].reshape(Co, 1).astype(jnp.float32)

    pmat = _scatter_mat(H, W)      # (4*HW, HW2) bf16, 0/1
    masks = _tap_masks(H2, W2)     # (9, 1, HW2) f32, 0/1

    # Grid sized to the TensorCores, not to N: 1 step on v5e/v6e, 2 on v7x.
    nblk = min(N, _num_tensorcores())
    if N % nblk:
        nblk = 1
    SB = N // nblk                 # samples per grid block (static in-kernel loop)

    kernel = _make_kernel(SB, Ci, Co, H, W)

    def const(shape):              # whole-array constant operand (same block every step)
        return pl.BlockSpec(shape, lambda g, _s=shape: (0,) * len(_s))

    out = pl.pallas_call(
        kernel,
        grid=(nblk,),
        in_specs=[
            pl.BlockSpec((SB, Ci, HW), lambda g: (g, 0, 0)),    # x (per block)
            pl.BlockSpec((SB, Co, HW2), lambda g: (g, 0, 0)),   # skip (per block)
            const((4 * Ci, Ci)),     # conv-transpose taps, stacked
            const((Ci, 1)),          # conv-transpose bias
            const((4 * HW, HW2)),    # stacked 0/1 scatter matrix
            const((9, 1, HW2)),      # 3x3 tap border masks
            const((9 * Co, Ct)),     # conv1 taps, stacked
            const((9 * Co, Co)),     # conv2 taps, stacked
            const((Co, Ct)),         # identity 1x1 weight
            const((Co, 1)),          # identity bias
        ],
        out_specs=pl.BlockSpec((SB, Co, HW2), lambda g: (g, 0, 0)),
        out_shape=jax.ShapeDtypeStruct((N, Co, HW2), jnp.float32),
        compiler_params=pltpu.CompilerParams(
            dimension_semantics=("parallel",),   # shards blocks across v7x's 2 TCs
        ),
    )(x3, sk3, upw_s, upb, pmat, masks, w1_s, w2_s, wid, idb)

    return out.reshape(N, Co, H2, W2)            # already NCHW


# ---------------------------------------------------------------------------
# Pure-JAX reference (independent of Pallas, f32 HIGHEST) for correctness check
# ---------------------------------------------------------------------------
def reference_forward(x_nchw, skip_nchw, params):
    Wt, bt = params["up_w"], params["up_b"]
    up = jnp.einsum("ncij,cokl->noikjl", x_nchw, Wt,
                    precision=jax.lax.Precision.HIGHEST)
    n, co, h, _, w, _ = up.shape
    up = up.reshape(n, co, 2 * h, 2 * w) + bt[None, :, None, None]
    xc = jnp.concatenate([up, skip_nchw], axis=1)

    def conv(x, wgt, pad):
        return jax.lax.conv_general_dilated(
            x, wgt, (1, 1), ((pad, pad), (pad, pad)),
            dimension_numbers=("NCHW", "OIHW", "NCHW"),
            precision=jax.lax.Precision.HIGHEST)

    def inorm_relu(x):
        m = jnp.mean(x, axis=(2, 3), keepdims=True)
        v = jnp.mean((x - m) ** 2, axis=(2, 3), keepdims=True)
        return jnp.maximum((x - m) * jax.lax.rsqrt(v + 1e-5), 0.0)

    hh = inorm_relu(conv(xc, params["conv1_w"], 1))
    hh = inorm_relu(conv(hh, params["conv2_w"], 1))
    res = conv(xc, params["id_w"], 0) + params["id_b"][None, :, None, None]
    return jnp.maximum(hh + res, 0.0)


# ---------------------------------------------------------------------------
if __name__ == "__main__":
    key = jax.random.PRNGKey(0)
    ks = jax.random.split(key, 8)

    in_channels, out_channels = 4, 4
    N, H, W = 2, 8, 8          # inputs:  (N, Cin, 8, 8)   -> upsampled to 16x16
                               # skip:    (N, Cout, 16, 16)

    params = {
        # ConvTranspose2d(in, in, 2, 2): weight (in, out, 2, 2), bias (in,)
        "up_w":   0.1 * jax.random.normal(ks[0], (in_channels, in_channels, 2, 2), jnp.float32),
        "up_b":   0.1 * jax.random.normal(ks[1], (in_channels,), jnp.float32),
        # ResBlock convs: Conv2d(Cin+Cout, Cout, 3) / Conv2d(Cout, Cout, 3), bias=False
        "conv1_w": 0.1 * jax.random.normal(ks[2], (out_channels, in_channels + out_channels, 3, 3), jnp.float32),
        "conv2_w": 0.1 * jax.random.normal(ks[3], (out_channels, out_channels, 3, 3), jnp.float32),
        # identity Conv2d(Cin+Cout, Cout, 1) with bias
        "id_w":   0.1 * jax.random.normal(ks[4], (out_channels, in_channels + out_channels, 1, 1), jnp.float32),
        "id_b":   0.1 * jax.random.normal(ks[5], (out_channels,), jnp.float32),
    }

    x = jax.random.normal(ks[6], (N, in_channels, H, W), jnp.float32)
    skip = jax.random.normal(ks[7], (N, out_channels, 2 * H, 2 * W), jnp.float32)

    fwd = jax.jit(upsample_conv_forward)
    out = fwd(x, skip, params)
    jax.block_until_ready(out)

    ref = reference_forward(x, skip, params)
    assert out.shape == (N, out_channels, 2 * H, 2 * W)
    # Kernel runs bf16 MXU operands with f32 accumulation; reference is f32 HIGHEST.
    err = float(jnp.max(jnp.abs(out - ref)))
    assert jnp.allclose(out, ref, atol=5e-2, rtol=5e-2), err

    print("KERNEL_OK")
</pallas_src>

<mosaic_0001>
module attributes {stable_mosaic.version = 11 : i64} {
  func.func @kernel(%arg0: i32, %arg1: memref<2x4x64xbf16, #tpu.memory_space<vmem>>, %arg2: memref<2x4x256xbf16, #tpu.memory_space<vmem>>, %arg3: memref<16x4xbf16, #tpu.memory_space<vmem>>, %arg4: memref<4x1xf32, #tpu.memory_space<vmem>>, %arg5: memref<256x256xbf16, #tpu.memory_space<vmem>>, %arg6: memref<9x1x256xf32, #tpu.memory_space<vmem>>, %arg7: memref<36x8xbf16, #tpu.memory_space<vmem>>, %arg8: memref<36x4xbf16, #tpu.memory_space<vmem>>, %arg9: memref<4x8xbf16, #tpu.memory_space<vmem>>, %arg10: memref<4x1xf32, #tpu.memory_space<vmem>>, %arg11: memref<2x4x256xf32, #tpu.memory_space<vmem>>) attributes {dimension_semantics = [#tpu.dimension_semantics<parallel>], iteration_bounds = array<i64: 1>, scalar_prefetch = 0 : i64, scratch_operands = 0 : i64, tpu.core_type = #tpu.core_type<tc>, window_params = [{transform_indices = @transform_0, window_bounds = array<i64: 2, 4, 64>}, {transform_indices = @transform_1, window_bounds = array<i64: 2, 4, 256>}, {pipeline_mode = #tpu.pipeline_mode<synchronous>, transform_indices = @transform_2, window_bounds = array<i64: 16, 4>}, {pipeline_mode = #tpu.pipeline_mode<synchronous>, transform_indices = @transform_3, window_bounds = array<i64: 4, 1>}, {pipeline_mode = #tpu.pipeline_mode<synchronous>, transform_indices = @transform_4, window_bounds = array<i64: 256, 256>}, {pipeline_mode = #tpu.pipeline_mode<synchronous>, transform_indices = @transform_5, window_bounds = array<i64: 9, 1, 256>}, {pipeline_mode = #tpu.pipeline_mode<synchronous>, transform_indices = @transform_6, window_bounds = array<i64: 36, 8>}, {pipeline_mode = #tpu.pipeline_mode<synchronous>, transform_indices = @transform_7, window_bounds = array<i64: 36, 4>}, {pipeline_mode = #tpu.pipeline_mode<synchronous>, transform_indices = @transform_8, window_bounds = array<i64: 4, 8>}, {pipeline_mode = #tpu.pipeline_mode<synchronous>, transform_indices = @transform_9, window_bounds = array<i64: 4, 1>}, {transform_indices = @transform_10, window_bounds = array<i64: 2, 4, 256>}]} {
    %c0 = arith.constant 0 : index
    %c0_0 = arith.constant 0 : index
    %c0_1 = arith.constant 0 : index
    %0 = vector.load %arg1[%c0, %c0_0, %c0_1] : memref<2x4x64xbf16, #tpu.memory_space<vmem>>, vector<1x4x64xbf16>
    %1 = vector.shape_cast %0 : vector<1x4x64xbf16> to vector<4x64xbf16>
    %c0_2 = arith.constant 0 : index
    %c0_3 = arith.constant 0 : index
    %c0_4 = arith.constant 0 : index
    %2 = vector.load %arg2[%c0_2, %c0_3, %c0_4] : memref<2x4x256xbf16, #tpu.memory_space<vmem>>, vector<1x4x256xbf16>
    %3 = vector.shape_cast %2 : vector<1x4x256xbf16> to vector<4x256xbf16>
    %c0_5 = arith.constant 0 : index
    %c0_6 = arith.constant 0 : index
    %4 = vector.load %arg3[%c0_5, %c0_6] : memref<16x4xbf16, #tpu.memory_space<vmem>>, vector<16x4xbf16>
    %cst = arith.constant dense<0.000000e+00> : vector<16x64xf32>
    %5 = tpu.matmul %4, %1, %cst {dimension_numbers = #tpu.dot_dimension_numbers<[1], [0], [0], [1], [0, 0, 1, 1], [], []>} : vector<16x4xbf16>, vector<4x64xbf16>, vector<16x64xf32> -> vector<16x64xf32>
    %6 = vector.extract_strided_slice %5 {offsets = [0, 0], sizes = [4, 64], strides = [1, 1]} : vector<16x64xf32> to vector<4x64xf32>
    %7 = vector.extract_strided_slice %5 {offsets = [4, 0], sizes = [4, 64], strides = [1, 1]} : vector<16x64xf32> to vector<4x64xf32>
    %8 = vector.extract_strided_slice %5 {offsets = [8, 0], sizes = [4, 64], strides = [1, 1]} : vector<16x64xf32> to vector<4x64xf32>
    %9 = vector.extract_strided_slice %5 {offsets = [12, 0], sizes = [4, 64], strides = [1, 1]} : vector<16x64xf32> to vector<4x64xf32>
    %10 = tpu.concatenate %6, %7, %8, %9 in 1 : vector<4x64xf32>, vector<4x64xf32>, vector<4x64xf32>, vector<4x64xf32> -> vector<4x256xf32>
    %11 = arith.truncf %10 : vector<4x256xf32> to vector<4x256xbf16>
    %c0_7 = arith.constant 0 : index
    %c0_8 = arith.constant 0 : index
    %12 = vector.load %arg5[%c0_7, %c0_8] : memref<256x256xbf16, #tpu.memory_space<vmem>>, vector<256x256xbf16>
    %cst_9 = arith.constant dense<0.000000e+00> : vector<4x256xf32>
    %13 = tpu.matmul %11, %12, %cst_9 {dimension_numbers = #tpu.dot_dimension_numbers<[1], [0], [0], [1], [0, 0, 1, 1], [], []>} : vector<4x256xbf16>, vector<256x256xbf16>, vector<4x256xf32> -> vector<4x256xf32>
    %c0_10 = arith.constant 0 : index
    %c0_11 = arith.constant 0 : index
    %14 = vector.load %arg4[%c0_10, %c0_11] : memref<4x1xf32, #tpu.memory_space<vmem>>, vector<4x1xf32>
    %15 = vector.broadcast %14 : vector<4x1xf32> to vector<4x256xf32>
    %16 = arith.addf %13, %15 : vector<4x256xf32>
    %17 = arith.truncf %16 : vector<4x256xf32> to vector<4x256xbf16>
    %18 = tpu.concatenate %17, %3 in 0 : vector<4x256xbf16>, vector<4x256xbf16> -> vector<8x256xbf16>
    %c0_12 = arith.constant 0 : index
    %c0_13 = arith.constant 0 : index
    %19 = vector.load %arg7[%c0_12, %c0_13] : memref<36x8xbf16, #tpu.memory_space<vmem>>, vector<36x8xbf16>
    %cst_14 = arith.constant dense<0.000000e+00> : vector<36x256xf32>
    %20 = tpu.matmul %19, %18, %cst_14 {dimension_numbers = #tpu.dot_dimension_numbers<[1], [0], [0], [1], [0, 0, 1, 1], [], []>} : vector<36x8xbf16>, vector<8x256xbf16>, vector<36x256xf32> -> vector<36x256xf32>
    %cst_15 = arith.constant 0.000000e+00 : f32
    %21 = vector.broadcast %cst_15 : f32 to vector<4x256xf32>
    %22 = vector.extract_strided_slice %20 {offsets = [0, 0], sizes = [4, 256], strides = [1, 1]} : vector<36x256xf32> to vector<4x256xf32>
    %c17_i32 = arith.constant 17 : i32
    %23 = tpu.dynamic_rotate %22 by %c17_i32 dim 1 : vector<4x256xf32>, i32 -> vector<4x256xf32>
    %c0_16 = arith.constant 0 : index
    %c0_17 = arith.constant 0 : index
    %c0_18 = arith.constant 0 : index
    %24 = vector.load %arg6[%c0_16, %c0_17, %c0_18] : memref<9x1x256xf32, #tpu.memory_space<vmem>>, vector<1x1x256xf32>
    %25 = vector.shape_cast %24 : vector<1x1x256xf32> to vector<1x256xf32>
    %26 = vector.broadcast %25 : vector<1x256xf32> to vector<4x256xf32>
    %27 = arith.mulf %23, %26 : vector<4x256xf32>
    %28 = arith.addf %21, %27 : vector<4x256xf32>
    %29 = vector.extract_strided_slice %20 {offsets = [4, 0], sizes = [4, 256], strides = [1, 1]} : vector<36x256xf32> to vector<4x256xf32>
    %c16_i32 = arith.constant 16 : i32
    %30 = tpu.dynamic_rotate %29 by %c16_i32 dim 1 : vector<4x256xf32>, i32 -> vector<4x256xf32>
    %c1 = arith.constant 1 : index
    %c0_19 = arith.constant 0 : index
    %c0_20 = arith.constant 0 : index
    %31 = vector.load %arg6[%c1, %c0_19, %c0_20] : memref<9x1x256xf32, #tpu.memory_space<vmem>>, vector<1x1x256xf32>
    %32 = vector.shape_cast %31 : vector<1x1x256xf32> to vector<1x256xf32>
    %33 = vector.broadcast %32 : vector<1x256xf32> to vector<4x256xf32>
    %34 = arith.mulf %30, %33 : vector<4x256xf32>
    %35 = arith.addf %28, %34 : vector<4x256xf32>
    %36 = vector.extract_strided_slice %20 {offsets = [8, 0], sizes = [4, 256], strides = [1, 1]} : vector<36x256xf32> to vector<4x256xf32>
    %c15_i32 = arith.constant 15 : i32
    %37 = tpu.dynamic_rotate %36 by %c15_i32 dim 1 : vector<4x256xf32>, i32 -> vector<4x256xf32>
    %c2 = arith.constant 2 : index
    %c0_21 = arith.constant 0 : index
    %c0_22 = arith.constant 0 : index
    %38 = vector.load %arg6[%c2, %c0_21, %c0_22] : memref<9x1x256xf32, #tpu.memory_space<vmem>>, vector<1x1x256xf32>
    %39 = vector.shape_cast %38 : vector<1x1x256xf32> to vector<1x256xf32>
    %40 = vector.broadcast %39 : vector<1x256xf32> to vector<4x256xf32>
    %41 = arith.mulf %37, %40 : vector<4x256xf32>
    %42 = arith.addf %35, %41 : vector<4x256xf32>
    %43 = vector.extract_strided_slice %20 {offsets = [12, 0], sizes = [4, 256], strides = [1, 1]} : vector<36x256xf32> to vector<4x256xf32>
    %c1_i32 = arith.constant 1 : i32
    %44 = tpu.dynamic_rotate %43 by %c1_i32 dim 1 : vector<4x256xf32>, i32 -> vector<4x256xf32>
    %c3 = arith.constant 3 : index
    %c0_23 = arith.constant 0 : index
    %c0_24 = arith.constant 0 : index
    %45 = vector.load %arg6[%c3, %c0_23, %c0_24] : memref<9x1x256xf32, #tpu.memory_space<vmem>>, vector<1x1x256xf32>
    %46 = vector.shape_cast %45 : vector<1x1x256xf32> to vector<1x256xf32>
    %47 = vector.broadcast %46 : vector<1x256xf32> to vector<4x256xf32>
    %48 = arith.mulf %44, %47 : vector<4x256xf32>
    %49 = arith.addf %42, %48 : vector<4x256xf32>
    %50 = vector.extract_strided_slice %20 {offsets = [16, 0], sizes = [4, 256], strides = [1, 1]} : vector<36x256xf32> to vector<4x256xf32>
    %51 = arith.addf %49, %50 : vector<4x256xf32>
    %52 = vector.extract_strided_slice %20 {offsets = [20, 0], sizes = [4, 256], strides = [1, 1]} : vector<36x256xf32> to vector<4x256xf32>
    %c255_i32 = arith.constant 255 : i32
    %53 = tpu.dynamic_rotate %52 by %c255_i32 dim 1 : vector<4x256xf32>, i32 -> vector<4x256xf32>
    %c5 = arith.constant 5 : index
    %c0_25 = arith.constant 0 : index
    %c0_26 = arith.constant 0 : index
    %54 = vector.load %arg6[%c5, %c0_25, %c0_26] : memref<9x1x256xf32, #tpu.memory_space<vmem>>, vector<1x1x256xf32>
    %55 = vector.shape_cast %54 : vector<1x1x256xf32> to vector<1x256xf32>
    %56 = vector.broadcast %55 : vector<1x256xf32> to vector<4x256xf32>
    %57 = arith.mulf %53, %56 : vector<4x256xf32>
    %58 = arith.addf %51, %57 : vector<4x256xf32>
    %59 = vector.extract_strided_slice %20 {offsets = [24, 0], sizes = [4, 256], strides = [1, 1]} : vector<36x256xf32> to vector<4x256xf32>
    %c241_i32 = arith.constant 241 : i32
    %60 = tpu.dynamic_rotate %59 by %c241_i32 dim 1 : vector<4x256xf32>, i32 -> vector<4x256xf32>
    %c6 = arith.constant 6 : index
    %c0_27 = arith.constant 0 : index
    %c0_28 = arith.constant 0 : index
    %61 = vector.load %arg6[%c6, %c0_27, %c0_28] : memref<9x1x256xf32, #tpu.memory_space<vmem>>, vector<1x1x256xf32>
    %62 = vector.shape_cast %61 : vector<1x1x256xf32> to vector<1x256xf32>
    %63 = vector.broadcast %62 : vector<1x256xf32> to vector<4x256xf32>
    %64 = arith.mulf %60, %63 : vector<4x256xf32>
    %65 = arith.addf %58, %64 : vector<4x256xf32>
    %66 = vector.extract_strided_slice %20 {offsets = [28, 0], sizes = [4, 256], strides = [1, 1]} : vector<36x256xf32> to vector<4x256xf32>
    %c240_i32 = arith.constant 240 : i32
    %67 = tpu.dynamic_rotate %66 by %c240_i32 dim 1 : vector<4x256xf32>, i32 -> vector<4x256xf32>
    %c7 = arith.constant 7 : index
    %c0_29 = arith.constant 0 : index
    %c0_30 = arith.constant 0 : index
    %68 = vector.load %arg6[%c7, %c0_29, %c0_30] : memref<9x1x256xf32, #tpu.memory_space<vmem>>, vector<1x1x256xf32>
    %69 = vector.shape_cast %68 : vector<1x1x256xf32> to vector<1x256xf32>
    %70 = vector.broadcast %69 : vector<1x256xf32> to vector<4x256xf32>
    %71 = arith.mulf %67, %70 : vector<4x256xf32>
    %72 = arith.addf %65, %71 : vector<4x256xf32>
    %73 = vector.extract_strided_slice %20 {offsets = [32, 0], sizes = [4, 256], strides = [1, 1]} : vector<36x256xf32> to vector<4x256xf32>
    %c239_i32 = arith.constant 239 : i32
    %74 = tpu.dynamic_rotate %73 by %c239_i32 dim 1 : vector<4x256xf32>, i32 -> vector<4x256xf32>
    %c8 = arith.constant 8 : index
    %c0_31 = arith.constant 0 : index
    %c0_32 = arith.constant 0 : index
    %75 = vector.load %arg6[%c8, %c0_31, %c0_32] : memref<9x1x256xf32, #tpu.memory_space<vmem>>, vector<1x1x256xf32>
    %76 = vector.shape_cast %75 : vector<1x1x256xf32> to vector<1x256xf32>
    %77 = vector.broadcast %76 : vector<1x256xf32> to vector<4x256xf32>
    %78 = arith.mulf %74, %77 : vector<4x256xf32>
    %79 = arith.addf %72, %78 : vector<4x256xf32>
    %80 = arith.mulf %79, %79 : vector<4x256xf32>
    %81 = tpu.concatenate %79, %80 in 0 : vector<4x256xf32>, vector<4x256xf32> -> vector<8x256xf32>
    %cst_33 = arith.constant dense<0.000000e+00> : vector<8xf32>
    %82 = vector.multi_reduction <add>, %81, %cst_33 [1] : vector<8x256xf32> to vector<8xf32>
    %83 = vector.shape_cast %82 : vector<8xf32> to vector<8x1xf32>
    %84 = vector.extract_strided_slice %83 {offsets = [0, 0], sizes = [4, 1], strides = [1, 1]} : vector<8x1xf32> to vector<4x1xf32>
    %cst_34 = arith.constant 3.906250e-03 : f32
    %85 = vector.broadcast %cst_34 : f32 to vector<4x1xf32>
    %86 = arith.mulf %84, %85 : vector<4x1xf32>
    %87 = vector.extract_strided_slice %83 {offsets = [4, 0], sizes = [4, 1], strides = [1, 1]} : vector<8x1xf32> to vector<4x1xf32>
    %cst_35 = arith.constant 3.906250e-03 : f32
    %88 = vector.broadcast %cst_35 : f32 to vector<4x1xf32>
    %89 = arith.mulf %87, %88 : vector<4x1xf32>
    %90 = arith.mulf %86, %86 : vector<4x1xf32>
    %91 = arith.subf %89, %90 : vector<4x1xf32>
    %cst_36 = arith.constant 0.000000e+00 : f32
    %92 = vector.broadcast %cst_36 : f32 to vector<4x1xf32>
    %93 = arith.maximumf %91, %92 : vector<4x1xf32>
    %94 = vector.broadcast %86 : vector<4x1xf32> to vector<4x256xf32>
    %95 = arith.subf %79, %94 : vector<4x256xf32>
    %cst_37 = arith.constant 9.99999974E-6 : f32
    %96 = vector.broadcast %cst_37 : f32 to vector<4x1xf32>
    %97 = arith.addf %93, %96 : vector<4x1xf32>
    %98 = math.rsqrt %97 : vector<4x1xf32>
    %99 = vector.broadcast %98 : vector<4x1xf32> to vector<4x256xf32>
    %100 = arith.mulf %95, %99 : vector<4x256xf32>
    %cst_38 = arith.constant 0.000000e+00 : f32
    %101 = vector.broadcast %cst_38 : f32 to vector<4x256xf32>
    %102 = arith.maximumf %100, %101 : vector<4x256xf32>
    %c0_39 = arith.constant 0 : index
    %c0_40 = arith.constant 0 : index
    %103 = vector.load %arg8[%c0_39, %c0_40] : memref<36x4xbf16, #tpu.memory_space<vmem>>, vector<36x4xbf16>
    %104 = arith.truncf %102 : vector<4x256xf32> to vector<4x256xbf16>
    %cst_41 = arith.constant dense<0.000000e+00> : vector<36x256xf32>
    %105 = tpu.matmul %103, %104, %cst_41 {dimension_numbers = #tpu.dot_dimension_numbers<[1], [0], [0], [1], [0, 0, 1, 1], [], []>} : vector<36x4xbf16>, vector<4x256xbf16>, vector<36x256xf32> -> vector<36x256xf32>
    %cst_42 = arith.constant 0.000000e+00 : f32
    %106 = vector.broadcast %cst_42 : f32 to vector<4x256xf32>
    %107 = vector.extract_strided_slice %105 {offsets = [0, 0], sizes = [4, 256], strides = [1, 1]} : vector<36x256xf32> to vector<4x256xf32>
    %c17_i32_43 = arith.constant 17 : i32
    %108 = tpu.dynamic_rotate %107 by %c17_i32_43 dim 1 : vector<4x256xf32>, i32 -> vector<4x256xf32>
    %c0_44 = arith.constant 0 : index
    %c0_45 = arith.constant 0 : index
    %c0_46 = arith.constant 0 : index
    %109 = vector.load %arg6[%c0_44, %c0_45, %c0_46] : memref<9x1x256xf32, #tpu.memory_space<vmem>>, vector<1x1x256xf32>
    %110 = vector.shape_cast %109 : vector<1x1x256xf32> to vector<1x256xf32>
    %111 = vector.broadcast %110 : vector<1x256xf32> to vector<4x256xf32>
    %112 = arith.mulf %108, %111 : vector<4x256xf32>
    %113 = arith.addf %106, %112 : vector<4x256xf32>
    %114 = vector.extract_strided_slice %105 {offsets = [4, 0], sizes = [4, 256], strides = [1, 1]} : vector<36x256xf32> to vector<4x256xf32>
    %c16_i32_47 = arith.constant 16 : i32
    %115 = tpu.dynamic_rotate %114 by %c16_i32_47 dim 1 : vector<4x256xf32>, i32 -> vector<4x256xf32>
    %c1_48 = arith.constant 1 : index
    %c0_49 = arith.constant 0 : index
    %c0_50 = arith.constant 0 : index
    %116 = vector.load %arg6[%c1_48, %c0_49, %c0_50] : memref<9x1x256xf32, #tpu.memory_space<vmem>>, vector<1x1x256xf32>
    %117 = vector.shape_cast %116 : vector<1x1x256xf32> to vector<1x256xf32>
    %118 = vector.broadcast %117 : vector<1x256xf32> to vector<4x256xf32>
    %119 = arith.mulf %115, %118 : vector<4x256xf32>
    %120 = arith.addf %113, %119 : vector<4x256xf32>
    %121 = vector.extract_strided_slice %105 {offsets = [8, 0], sizes = [4, 256], strides = [1, 1]} : vector<36x256xf32> to vector<4x256xf32>
    %c15_i32_51 = arith.constant 15 : i32
    %122 = tpu.dynamic_rotate %121 by %c15_i32_51 dim 1 : vector<4x256xf32>, i32 -> vector<4x256xf32>
    %c2_52 = arith.constant 2 : index
    %c0_53 = arith.constant 0 : index
    %c0_54 = arith.constant 0 : index
    %123 = vector.load %arg6[%c2_52, %c0_53, %c0_54] : memref<9x1x256xf32, #tpu.memory_space<vmem>>, vector<1x1x256xf32>
    %124 = vector.shape_cast %123 : vector<1x1x256xf32> to vector<1x256xf32>
    %125 = vector.broadcast %124 : vector<1x256xf32> to vector<4x256xf32>
    %126 = arith.mulf %122, %125 : vector<4x256xf32>
    %127 = arith.addf %120, %126 : vector<4x256xf32>
    %128 = vector.extract_strided_slice %105 {offsets = [12, 0], sizes = [4, 256], strides = [1, 1]} : vector<36x256xf32> to vector<4x256xf32>
    %c1_i32_55 = arith.constant 1 : i32
    %129 = tpu.dynamic_rotate %128 by %c1_i32_55 dim 1 : vector<4x256xf32>, i32 -> vector<4x256xf32>
    %c3_56 = arith.constant 3 : index
    %c0_57 = arith.constant 0 : index
    %c0_58 = arith.constant 0 : index
    %130 = vector.load %arg6[%c3_56, %c0_57, %c0_58] : memref<9x1x256xf32, #tpu.memory_space<vmem>>, vector<1x1x256xf32>
    %131 = vector.shape_cast %130 : vector<1x1x256xf32> to vector<1x256xf32>
    %132 = vector.broadcast %131 : vector<1x256xf32> to vector<4x256xf32>
    %133 = arith.mulf %129, %132 : vector<4x256xf32>
    %134 = arith.addf %127, %133 : vector<4x256xf32>
    %135 = vector.extract_strided_slice %105 {offsets = [16, 0], sizes = [4, 256], strides = [1, 1]} : vector<36x256xf32> to vector<4x256xf32>
    %136 = arith.addf %134, %135 : vector<4x256xf32>
    %137 = vector.extract_strided_slice %105 {offsets = [20, 0], sizes = [4, 256], strides = [1, 1]} : vector<36x256xf32> to vector<4x256xf32>
    %c255_i32_59 = arith.constant 255 : i32
    %138 = tpu.dynamic_rotate %137 by %c255_i32_59 dim 1 : vector<4x256xf32>, i32 -> vector<4x256xf32>
    %c5_60 = arith.constant 5 : index
    %c0_61 = arith.constant 0 : index
    %c0_62 = arith.constant 0 : index
    %139 = vector.load %arg6[%c5_60, %c0_61, %c0_62] : memref<9x1x256xf32, #tpu.memory_space<vmem>>, vector<1x1x256xf32>
    %140 = vector.shape_cast %139 : vector<1x1x256xf32> to vector<1x256xf32>
    %141 = vector.broadcast %140 : vector<1x256xf32> to vector<4x256xf32>
    %142 = arith.mulf %138, %141 : vector<4x256xf32>
    %143 = arith.addf %136, %142 : vector<4x256xf32>
    %144 = vector.extract_strided_slice %105 {offsets = [24, 0], sizes = [4, 256], strides = [1, 1]} : vector<36x256xf32> to vector<4x256xf32>
    %c241_i32_63 = arith.constant 241 : i32
    %145 = tpu.dynamic_rotate %144 by %c241_i32_63 dim 1 : vector<4x256xf32>, i32 -> vector<4x256xf32>
    %c6_64 = arith.constant 6 : index
    %c0_65 = arith.constant 0 : index
    %c0_66 = arith.constant 0 : index
    %146 = vector.load %arg6[%c6_64, %c0_65, %c0_66] : memref<9x1x256xf32, #tpu.memory_space<vmem>>, vector<1x1x256xf32>
    %147 = vector.shape_cast %146 : vector<1x1x256xf32> to vector<1x256xf32>
    %148 = vector.broadcast %147 : vector<1x256xf32> to vector<4x256xf32>
    %149 = arith.mulf %145, %148 : vector<4x256xf32>
    %150 = arith.addf %143, %149 : vector<4x256xf32>
    %151 = vector.extract_strided_slice %105 {offsets = [28, 0], sizes = [4, 256], strides = [1, 1]} : vector<36x256xf32> to vector<4x256xf32>
    %c240_i32_67 = arith.constant 240 : i32
    %152 = tpu.dynamic_rotate %151 by %c240_i32_67 dim 1 : vector<4x256xf32>, i32 -> vector<4x256xf32>
    %c7_68 = arith.constant 7 : index
    %c0_69 = arith.constant 0 : index
    %c0_70 = arith.constant 0 : index
    %153 = vector.load %arg6[%c7_68, %c0_69, %c0_70] : memref<9x1x256xf32, #tpu.memory_space<vmem>>, vector<1x1x256xf32>
    %154 = vector.shape_cast %153 : vector<1x1x256xf32> to vector<1x256xf32>
    %155 = vector.broadcast %154 : vector<1x256xf32> to vector<4x256xf32>
    %156 = arith.mulf %152, %155 : vector<4x256xf32>
    %157 = arith.addf %150, %156 : vector<4x256xf32>
    %158 = vector.extract_strided_slice %105 {offsets = [32, 0], sizes = [4, 256], strides = [1, 1]} : vector<36x256xf32> to vector<4x256xf32>
    %c239_i32_71 = arith.constant 239 : i32
    %159 = tpu.dynamic_rotate %158 by %c239_i32_71 dim 1 : vector<4x256xf32>, i32 -> vector<4x256xf32>
    %c8_72 = arith.constant 8 : index
    %c0_73 = arith.constant 0 : index
    %c0_74 = arith.constant 0 : index
    %160 = vector.load %arg6[%c8_72, %c0_73, %c0_74] : memref<9x1x256xf32, #tpu.memory_space<vmem>>, vector<1x1x256xf32>
    %161 = vector.shape_cast %160 : vector<1x1x256xf32> to vector<1x256xf32>
    %162 = vector.broadcast %161 : vector<1x256xf32> to vector<4x256xf32>
    %163 = arith.mulf %159, %162 : vector<4x256xf32>
    %164 = arith.addf %157, %163 : vector<4x256xf32>
    %165 = arith.mulf %164, %164 : vector<4x256xf32>
    %166 = tpu.concatenate %164, %165 in 0 : vector<4x256xf32>, vector<4x256xf32> -> vector<8x256xf32>
    %cst_75 = arith.constant dense<0.000000e+00> : vector<8xf32>
    %167 = vector.multi_reduction <add>, %166, %cst_75 [1] : vector<8x256xf32> to vector<8xf32>
    %168 = vector.shape_cast %167 : vector<8xf32> to vector<8x1xf32>
    %169 = vector.extract_strided_slice %168 {offsets = [0, 0], sizes = [4, 1], strides = [1, 1]} : vector<8x1xf32> to vector<4x1xf32>
    %cst_76 = arith.constant 3.906250e-03 : f32
    %170 = vector.broadcast %cst_76 : f32 to vector<4x1xf32>
    %171 = arith.mulf %169, %170 : vector<4x1xf32>
    %172 = vector.extract_strided_slice %168 {offsets = [4, 0], sizes = [4, 1], strides = [1, 1]} : vector<8x1xf32> to vector<4x1xf32>
    %cst_77 = arith.constant 3.906250e-03 : f32
    %173 = vector.broadcast %cst_77 : f32 to vector<4x1xf32>
    %174 = arith.mulf %172, %173 : vector<4x1xf32>
    %175 = arith.mulf %171, %171 : vector<4x1xf32>
    %176 = arith.subf %174, %175 : vector<4x1xf32>
    %cst_78 = arith.constant 0.000000e+00 : f32
    %177 = vector.broadcast %cst_78 : f32 to vector<4x1xf32>
    %178 = arith.maximumf %176, %177 : vector<4x1xf32>
    %179 = vector.broadcast %171 : vector<4x1xf32> to vector<4x256xf32>
    %180 = arith.subf %164, %179 : vector<4x256xf32>
    %cst_79 = arith.constant 9.99999974E-6 : f32
    %181 = vector.broadcast %cst_79 : f32 to vector<4x1xf32>
    %182 = arith.addf %178, %181 : vector<4x1xf32>
    %183 = math.rsqrt %182 : vector<4x1xf32>
    %184 = vector.broadcast %183 : vector<4x1xf32> to vector<4x256xf32>
    %185 = arith.mulf %180, %184 : vector<4x256xf32>
    %cst_80 = arith.constant 0.000000e+00 : f32
    %186 = vector.broadcast %cst_80 : f32 to vector<4x256xf32>
    %187 = arith.maximumf %185, %186 : vector<4x256xf32>
    %c0_81 = arith.constant 0 : index
    %c0_82 = arith.constant 0 : index
    %188 = vector.load %arg9[%c0_81, %c0_82] : memref<4x8xbf16, #tpu.memory_space<vmem>>, vector<4x8xbf16>
    %cst_83 = arith.constant dense<0.000000e+00> : vector<4x256xf32>
    %189 = tpu.matmul %188, %18, %cst_83 {dimension_numbers = #tpu.dot_dimension_numbers<[1], [0], [0], [1], [0, 0, 1, 1], [], []>} : vector<4x8xbf16>, vector<8x256xbf16>, vector<4x256xf32> -> vector<4x256xf32>
    %c0_84 = arith.constant 0 : index
    %c0_85 = arith.constant 0 : index
    %190 = vector.load %arg10[%c0_84, %c0_85] : memref<4x1xf32, #tpu.memory_space<vmem>>, vector<4x1xf32>
    %191 = vector.broadcast %190 : vector<4x1xf32> to vector<4x256xf32>
    %192 = arith.addf %189, %191 : vector<4x256xf32>
    %193 = arith.addf %187, %192 : vector<4x256xf32>
    %cst_86 = arith.constant 0.000000e+00 : f32
    %194 = vector.broadcast %cst_86 : f32 to vector<4x256xf32>
    %195 = arith.maximumf %193, %194 : vector<4x256xf32>
    %c0_87 = arith.constant 0 : index
    %c0_88 = arith.constant 0 : index
    %c0_89 = arith.constant 0 : index
    %196 = vector.load %arg11[%c0_87, %c0_88, %c0_89] : memref<2x4x256xf32, #tpu.memory_space<vmem>>, vector<1x4x256xf32>
    %197 = vector.shape_cast %196 : vector<1x4x256xf32> to vector<4x256xf32>
    %198 = vector.shape_cast %195 : vector<4x256xf32> to vector<1x4x256xf32>
    tpu.vector_store %arg11[%c0_87, %c0_88, %c0_89], %198 {strides = array<i32>} : memref<2x4x256xf32, #tpu.memory_space<vmem>>, vector<1x4x256xf32>,
    %c1_90 = arith.constant 1 : index
    %c0_91 = arith.constant 0 : index
    %c0_92 = arith.constant 0 : index
    %199 = vector.load %arg1[%c1_90, %c0_91, %c0_92] : memref<2x4x64xbf16, #tpu.memory_space<vmem>>, vector<1x4x64xbf16>
    %200 = vector.shape_cast %199 : vector<1x4x64xbf16> to vector<4x64xbf16>
    %c1_93 = arith.constant 1 : index
    %c0_94 = arith.constant 0 : index
    %c0_95 = arith.constant 0 : index
    %201 = vector.load %arg2[%c1_93, %c0_94, %c0_95] : memref<2x4x256xbf16, #tpu.memory_space<vmem>>, vector<1x4x256xbf16>
    %202 = vector.shape_cast %201 : vector<1x4x256xbf16> to vector<4x256xbf16>
    %c0_96 = arith.constant 0 : index
    %c0_97 = arith.constant 0 : index
    %203 = vector.load %arg3[%c0_96, %c0_97] : memref<16x4xbf16, #tpu.memory_space<vmem>>, vector<16x4xbf16>
    %cst_98 = arith.constant dense<0.000000e+00> : vector<16x64xf32>
    %204 = tpu.matmul %203, %200, %cst_98 {dimension_numbers = #tpu.dot_dimension_numbers<[1], [0], [0], [1], [0, 0, 1, 1], [], []>} : vector<16x4xbf16>, vector<4x64xbf16>, vector<16x64xf32> -> vector<16x64xf32>
    %205 = vector.extract_strided_slice %204 {offsets = [0, 0], sizes = [4, 64], strides = [1, 1]} : vector<16x64xf32> to vector<4x64xf32>
    %206 = vector.extract_strided_slice %204 {offsets = [4, 0], sizes = [4, 64], strides = [1, 1]} : vector<16x64xf32> to vector<4x64xf32>
    %207 = vector.extract_strided_slice %204 {offsets = [8, 0], sizes = [4, 64], strides = [1, 1]} : vector<16x64xf32> to vector<4x64xf32>
    %208 = vector.extract_strided_slice %204 {offsets = [12, 0], sizes = [4, 64], strides = [1, 1]} : vector<16x64xf32> to vector<4x64xf32>
    %209 = tpu.concatenate %205, %206, %207, %208 in 1 : vector<4x64xf32>, vector<4x64xf32>, vector<4x64xf32>, vector<4x64xf32> -> vector<4x256xf32>
    %210 = arith.truncf %209 : vector<4x256xf32> to vector<4x256xbf16>
    %c0_99 = arith.constant 0 : index
    %c0_100 = arith.constant 0 : index
    %211 = vector.load %arg5[%c0_99, %c0_100] : memref<256x256xbf16, #tpu.memory_space<vmem>>, vector<256x256xbf16>
    %cst_101 = arith.constant dense<0.000000e+00> : vector<4x256xf32>
    %212 = tpu.matmul %210, %211, %cst_101 {dimension_numbers = #tpu.dot_dimension_numbers<[1], [0], [0], [1], [0, 0, 1, 1], [], []>} : vector<4x256xbf16>, vector<256x256xbf16>, vector<4x256xf32> -> vector<4x256xf32>
    %c0_102 = arith.constant 0 : index
    %c0_103 = arith.constant 0 : index
    %213 = vector.load %arg4[%c0_102, %c0_103] : memref<4x1xf32, #tpu.memory_space<vmem>>, vector<4x1xf32>
    %214 = vector.broadcast %213 : vector<4x1xf32> to vector<4x256xf32>
    %215 = arith.addf %212, %214 : vector<4x256xf32>
    %216 = arith.truncf %215 : vector<4x256xf32> to vector<4x256xbf16>
    %217 = tpu.concatenate %216, %202 in 0 : vector<4x256xbf16>, vector<4x256xbf16> -> vector<8x256xbf16>
    %c0_104 = arith.constant 0 : index
    %c0_105 = arith.constant 0 : index
    %218 = vector.load %arg7[%c0_104, %c0_105] : memref<36x8xbf16, #tpu.memory_space<vmem>>, vector<36x8xbf16>
    %cst_106 = arith.constant dense<0.000000e+00> : vector<36x256xf32>
    %219 = tpu.matmul %218, %217, %cst_106 {dimension_numbers = #tpu.dot_dimension_numbers<[1], [0], [0], [1], [0, 0, 1, 1], [], []>} : vector<36x8xbf16>, vector<8x256xbf16>, vector<36x256xf32> -> vector<36x256xf32>
    %cst_107 = arith.constant 0.000000e+00 : f32
    %220 = vector.broadcast %cst_107 : f32 to vector<4x256xf32>
    %221 = vector.extract_strided_slice %219 {offsets = [0, 0], sizes = [4, 256], strides = [1, 1]} : vector<36x256xf32> to vector<4x256xf32>
    %c17_i32_108 = arith.constant 17 : i32
    %222 = tpu.dynamic_rotate %221 by %c17_i32_108 dim 1 : vector<4x256xf32>, i32 -> vector<4x256xf32>
    %c0_109 = arith.constant 0 : index
    %c0_110 = arith.constant 0 : index
    %c0_111 = arith.constant 0 : index
    %223 = vector.load %arg6[%c0_109, %c0_110, %c0_111] : memref<9x1x256xf32, #tpu.memory_space<vmem>>, vector<1x1x256xf32>
    %224 = vector.shape_cast %223 : vector<1x1x256xf32> to vector<1x256xf32>
    %225 = vector.broadcast %224 : vector<1x256xf32> to vector<4x256xf32>
    %226 = arith.mulf %222, %225 : vector<4x256xf32>
    %227 = arith.addf %220, %226 : vector<4x256xf32>
    %228 = vector.extract_strided_slice %219 {offsets = [4, 0], sizes = [4, 256], strides = [1, 1]} : vector<36x256xf32> to vector<4x256xf32>
    %c16_i32_112 = arith.constant 16 : i32
    %229 = tpu.dynamic_rotate %228 by %c16_i32_112 dim 1 : vector<4x256xf32>, i32 -> vector<4x256xf32>
    %c1_113 = arith.constant 1 : index
    %c0_114 = arith.constant 0 : index
    %c0_115 = arith.constant 0 : index
    %230 = vector.load %arg6[%c1_113, %c0_114, %c0_115] : memref<9x1x256xf32, #tpu.memory_space<vmem>>, vector<1x1x256xf32>
    %231 = vector.shape_cast %230 : vector<1x1x256xf32> to vector<1x256xf32>
    %232 = vector.broadcast %231 : vector<1x256xf32> to vector<4x256xf32>
    %233 = arith.mulf %229, %232 : vector<4x256xf32>
    %234 = arith.addf %227, %233 : vector<4x256xf32>
    %235 = vector.extract_strided_slice %219 {offsets = [8, 0], sizes = [4, 256], strides = [1, 1]} : vector<36x256xf32> to vector<4x256xf32>
    %c15_i32_116 = arith.constant 15 : i32
    %236 = tpu.dynamic_rotate %235 by %c15_i32_116 dim 1 : vector<4x256xf32>, i32 -> vector<4x256xf32>
    %c2_117 = arith.constant 2 : index
    %c0_118 = arith.constant 0 : index
    %c0_119 = arith.constant 0 : index
    %237 = vector.load %arg6[%c2_117, %c0_118, %c0_119] : memref<9x1x256xf32, #tpu.memory_space<vmem>>, vector<1x1x256xf32>
    %238 = vector.shape_cast %237 : vector<1x1x256xf32> to vector<1x256xf32>
    %239 = vector.broadcast %238 : vector<1x256xf32> to vector<4x256xf32>
    %240 = arith.mulf %236, %239 : vector<4x256xf32>
    %241 = arith.addf %234, %240 : vector<4x256xf32>
    %242 = vector.extract_strided_slice %219 {offsets = [12, 0], sizes = [4, 256], strides = [1, 1]} : vector<36x256xf32> to vector<4x256xf32>
    %c1_i32_120 = arith.constant 1 : i32
    %243 = tpu.dynamic_rotate %242 by %c1_i32_120 dim 1 : vector<4x256xf32>, i32 -> vector<4x256xf32>
    %c3_121 = arith.constant 3 : index
    %c0_122 = arith.constant 0 : index
    %c0_123 = arith.constant 0 : index
    %244 = vector.load %arg6[%c3_121, %c0_122, %c0_123] : memref<9x1x256xf32, #tpu.memory_space<vmem>>, vector<1x1x256xf32>
    %245 = vector.shape_cast %244 : vector<1x1x256xf32> to vector<1x256xf32>
    %246 = vector.broadcast %245 : vector<1x256xf32> to vector<4x256xf32>
    %247 = arith.mulf %243, %246 : vector<4x256xf32>
    %248 = arith.addf %241, %247 : vector<4x256xf32>
    %249 = vector.extract_strided_slice %219 {offsets = [16, 0], sizes = [4, 256], strides = [1, 1]} : vector<36x256xf32> to vector<4x256xf32>
    %250 = arith.addf %248, %249 : vector<4x256xf32>
    %251 = vector.extract_strided_slice %219 {offsets = [20, 0], sizes = [4, 256], strides = [1, 1]} : vector<36x256xf32> to vector<4x256xf32>
    %c255_i32_124 = arith.constant 255 : i32
    %252 = tpu.dynamic_rotate %251 by %c255_i32_124 dim 1 : vector<4x256xf32>, i32 -> vector<4x256xf32>
    %c5_125 = arith.constant 5 : index
    %c0_126 = arith.constant 0 : index
    %c0_127 = arith.constant 0 : index
    %253 = vector.load %arg6[%c5_125, %c0_126, %c0_127] : memref<9x1x256xf32, #tpu.memory_space<vmem>>, vector<1x1x256xf32>
    %254 = vector.shape_cast %253 : vector<1x1x256xf32> to vector<1x256xf32>
    %255 = vector.broadcast %254 : vector<1x256xf32> to vector<4x256xf32>
    %256 = arith.mulf %252, %255 : vector<4x256xf32>
    %257 = arith.addf %250, %256 : vector<4x256xf32>
    %258 = vector.extract_strided_slice %219 {offsets = [24, 0], sizes = [4, 256], strides = [1, 1]} : vector<36x256xf32> to vector<4x256xf32>
    %c241_i32_128 = arith.constant 241 : i32
    %259 = tpu.dynamic_rotate %258 by %c241_i32_128 dim 1 : vector<4x256xf32>, i32 -> vector<4x256xf32>
    %c6_129 = arith.constant 6 : index
    %c0_130 = arith.constant 0 : index
    %c0_131 = arith.constant 0 : index
    %260 = vector.load %arg6[%c6_129, %c0_130, %c0_131] : memref<9x1x256xf32, #tpu.memory_space<vmem>>, vector<1x1x256xf32>
    %261 = vector.shape_cast %260 : vector<1x1x256xf32> to vector<1x256xf32>
    %262 = vector.broadcast %261 : vector<1x256xf32> to vector<4x256xf32>
    %263 = arith.mulf %259, %262 : vector<4x256xf32>
    %264 = arith.addf %257, %263 : vector<4x256xf32>
    %265 = vector.extract_strided_slice %219 {offsets = [28, 0], sizes = [4, 256], strides = [1, 1]} : vector<36x256xf32> to vector<4x256xf32>
    %c240_i32_132 = arith.constant 240 : i32
    %266 = tpu.dynamic_rotate %265 by %c240_i32_132 dim 1 : vector<4x256xf32>, i32 -> vector<4x256xf32>
    %c7_133 = arith.constant 7 : index
    %c0_134 = arith.constant 0 : index
    %c0_135 = arith.constant 0 : index
    %267 = vector.load %arg6[%c7_133, %c0_134, %c0_135] : memref<9x1x256xf32, #tpu.memory_space<vmem>>, vector<1x1x256xf32>
    %268 = vector.shape_cast %267 : vector<1x1x256xf32> to vector<1x256xf32>
    %269 = vector.broadcast %268 : vector<1x256xf32> to vector<4x256xf32>
    %270 = arith.mulf %266, %269 : vector<4x256xf32>
    %271 = arith.addf %264, %270 : vector<4x256xf32>
    %272 = vector.extract_strided_slice %219 {offsets = [32, 0], sizes = [4, 256], strides = [1, 1]} : vector<36x256xf32> to vector<4x256xf32>
    %c239_i32_136 = arith.constant 239 : i32
    %273 = tpu.dynamic_rotate %272 by %c239_i32_136 dim 1 : vector<4x256xf32>, i32 -> vector<4x256xf32>
    %c8_137 = arith.constant 8 : index
    %c0_138 = arith.constant 0 : index
    %c0_139 = arith.constant 0 : index
    %274 = vector.load %arg6[%c8_137, %c0_138, %c0_139] : memref<9x1x256xf32, #tpu.memory_space<vmem>>, vector<1x1x256xf32>
    %275 = vector.shape_cast %274 : vector<1x1x256xf32> to vector<1x256xf32>
    %276 = vector.broadcast %275 : vector<1x256xf32> to vector<4x256xf32>
    %277 = arith.mulf %273, %276 : vector<4x256xf32>
    %278 = arith.addf %271, %277 : vector<4x256xf32>
    %279 = arith.mulf %278, %278 : vector<4x256xf32>
    %280 = tpu.concatenate %278, %279 in 0 : vector<4x256xf32>, vector<4x256xf32> -> vector<8x256xf32>
    %cst_140 = arith.constant dense<0.000000e+00> : vector<8xf32>
    %281 = vector.multi_reduction <add>, %280, %cst_140 [1] : vector<8x256xf32> to vector<8xf32>
    %282 = vector.shape_cast %281 : vector<8xf32> to vector<8x1xf32>
    %283 = vector.extract_strided_slice %282 {offsets = [0, 0], sizes = [4, 1], strides = [1, 1]} : vector<8x1xf32> to vector<4x1xf32>
    %cst_141 = arith.constant 3.906250e-03 : f32
    %284 = vector.broadcast %cst_141 : f32 to vector<4x1xf32>
    %285 = arith.mulf %283, %284 : vector<4x1xf32>
    %286 = vector.extract_strided_slice %282 {offsets = [4, 0], sizes = [4, 1], strides = [1, 1]} : vector<8x1xf32> to vector<4x1xf32>
    %cst_142 = arith.constant 3.906250e-03 : f32
    %287 = vector.broadcast %cst_142 : f32 to vector<4x1xf32>
    %288 = arith.mulf %286, %287 : vector<4x1xf32>
    %289 = arith.mulf %285, %285 : vector<4x1xf32>
    %290 = arith.subf %288, %289 : vector<4x1xf32>
    %cst_143 = arith.constant 0.000000e+00 : f32
    %291 = vector.broadcast %cst_143 : f32 to vector<4x1xf32>
    %292 = arith.maximumf %290, %291 : vector<4x1xf32>
    %293 = vector.broadcast %285 : vector<4x1xf32> to vector<4x256xf32>
    %294 = arith.subf %278, %293 : vector<4x256xf32>
    %cst_144 = arith.constant 9.99999974E-6 : f32
    %295 = vector.broadcast %cst_144 : f32 to vector<4x1xf32>
    %296 = arith.addf %292, %295 : vector<4x1xf32>
    %297 = math.rsqrt %296 : vector<4x1xf32>
    %298 = vector.broadcast %297 : vector<4x1xf32> to vector<4x256xf32>
    %299 = arith.mulf %294, %298 : vector<4x256xf32>
    %cst_145 = arith.constant 0.000000e+00 : f32
    %300 = vector.broadcast %cst_145 : f32 to vector<4x256xf32>
    %301 = arith.maximumf %299, %300 : vector<4x256xf32>
    %c0_146 = arith.constant 0 : index
    %c0_147 = arith.constant 0 : index
    %302 = vector.load %arg8[%c0_146, %c0_147] : memref<36x4xbf16, #tpu.memory_space<vmem>>, vector<36x4xbf16>
    %303 = arith.truncf %301 : vector<4x256xf32> to vector<4x256xbf16>
    %cst_148 = arith.constant dense<0.000000e+00> : vector<36x256xf32>
    %304 = tpu.matmul %302, %303, %cst_148 {dimension_numbers = #tpu.dot_dimension_numbers<[1], [0], [0], [1], [0, 0, 1, 1], [], []>} : vector<36x4xbf16>, vector<4x256xbf16>, vector<36x256xf32> -> vector<36x256xf32>
    %cst_149 = arith.constant 0.000000e+00 : f32
    %305 = vector.broadcast %cst_149 : f32 to vector<4x256xf32>
    %306 = vector.extract_strided_slice %304 {offsets = [0, 0], sizes = [4, 256], strides = [1, 1]} : vector<36x256xf32> to vector<4x256xf32>
    %c17_i32_150 = arith.constant 17 : i32
    %307 = tpu.dynamic_rotate %306 by %c17_i32_150 dim 1 : vector<4x256xf32>, i32 -> vector<4x256xf32>
    %c0_151 = arith.constant 0 : index
    %c0_152 = arith.constant 0 : index
    %c0_153 = arith.constant 0 : index
    %308 = vector.load %arg6[%c0_151, %c0_152, %c0_153] : memref<9x1x256xf32, #tpu.memory_space<vmem>>, vector<1x1x256xf32>
    %309 = vector.shape_cast %308 : vector<1x1x256xf32> to vector<1x256xf32>
    %310 = vector.broadcast %309 : vector<1x256xf32> to vector<4x256xf32>
    %311 = arith.mulf %307, %310 : vector<4x256xf32>
    %312 = arith.addf %305, %311 : vector<4x256xf32>
    %313 = vector.extract_strided_slice %304 {offsets = [4, 0], sizes = [4, 256], strides = [1, 1]} : vector<36x256xf32> to vector<4x256xf32>
    %c16_i32_154 = arith.constant 16 : i32
    %314 = tpu.dynamic_rotate %313 by %c16_i32_154 dim 1 : vector<4x256xf32>, i32 -> vector<4x256xf32>
    %c1_155 = arith.constant 1 : index
    %c0_156 = arith.constant 0 : index
    %c0_157 = arith.constant 0 : index
    %315 = vector.load %arg6[%c1_155, %c0_156, %c0_157] : memref<9x1x256xf32, #tpu.memory_space<vmem>>, vector<1x1x256xf32>
    %316 = vector.shape_cast %315 : vector<1x1x256xf32> to vector<1x256xf32>
    %317 = vector.broadcast %316 : vector<1x256xf32> to vector<4x256xf32>
    %318 = arith.mulf %314, %317 : vector<4x256xf32>
    %319 = arith.addf %312, %318 : vector<4x256xf32>
    %320 = vector.extract_strided_slice %304 {offsets = [8, 0], sizes = [4, 256], strides = [1, 1]} : vector<36x256xf32> to vector<4x256xf32>
    %c15_i32_158 = arith.constant 15 : i32
    %321 = tpu.dynamic_rotate %320 by %c15_i32_158 dim 1 : vector<4x256xf32>, i32 -> vector<4x256xf32>
    %c2_159 = arith.constant 2 : index
    %c0_160 = arith.constant 0 : index
    %c0_161 = arith.constant 0 : index
    %322 = vector.load %arg6[%c2_159, %c0_160, %c0_161] : memref<9x1x256xf32, #tpu.memory_space<vmem>>, vector<1x1x256xf32>
    %323 = vector.shape_cast %322 : vector<1x1x256xf32> to vector<1x256xf32>
    %324 = vector.broadcast %323 : vector<1x256xf32> to vector<4x256xf32>
    %325 = arith.mulf %321, %324 : vector<4x256xf32>
    %326 = arith.addf %319, %325 : vector<4x256xf32>
    %327 = vector.extract_strided_slice %304 {offsets = [12, 0], sizes = [4, 256], strides = [1, 1]} : vector<36x256xf32> to vector<4x256xf32>
    %c1_i32_162 = arith.constant 1 : i32
    %328 = tpu.dynamic_rotate %327 by %c1_i32_162 dim 1 : vector<4x256xf32>, i32 -> vector<4x256xf32>
    %c3_163 = arith.constant 3 : index
    %c0_164 = arith.constant 0 : index
    %c0_165 = arith.constant 0 : index
    %329 = vector.load %arg6[%c3_163, %c0_164, %c0_165] : memref<9x1x256xf32, #tpu.memory_space<vmem>>, vector<1x1x256xf32>
    %330 = vector.shape_cast %329 : vector<1x1x256xf32> to vector<1x256xf32>
    %331 = vector.broadcast %330 : vector<1x256xf32> to vector<4x256xf32>
    %332 = arith.mulf %328, %331 : vector<4x256xf32>
    %333 = arith.addf %326, %332 : vector<4x256xf32>
    %334 = vector.extract_strided_slice %304 {offsets = [16, 0], sizes = [4, 256], strides = [1, 1]} : vector<36x256xf32> to vector<4x256xf32>
    %335 = arith.addf %333, %334 : vector<4x256xf32>
    %336 = vector.extract_strided_slice %304 {offsets = [20, 0], sizes = [4, 256], strides = [1, 1]} : vector<36x256xf32> to vector<4x256xf32>
    %c255_i32_166 = arith.constant 255 : i32
    %337 = tpu.dynamic_rotate %336 by %c255_i32_166 dim 1 : vector<4x256xf32>, i32 -> vector<4x256xf32>
    %c5_167 = arith.constant 5 : index
    %c0_168 = arith.constant 0 : index
    %c0_169 = arith.constant 0 : index
    %338 = vector.load %arg6[%c5_167, %c0_168, %c0_169] : memref<9x1x256xf32, #tpu.memory_space<vmem>>, vector<1x1x256xf32>
    %339 = vector.shape_cast %338 : vector<1x1x256xf32> to vector<1x256xf32>
    %340 = vector.broadcast %339 : vector<1x256xf32> to vector<4x256xf32>
    %341 = arith.mulf %337, %340 : vector<4x256xf32>
    %342 = arith.addf %335, %341 : vector<4x256xf32>
    %343 = vector.extract_strided_slice %304 {offsets = [24, 0], sizes = [4, 256], strides = [1, 1]} : vector<36x256xf32> to vector<4x256xf32>
    %c241_i32_170 = arith.constant 241 : i32
    %344 = tpu.dynamic_rotate %343 by %c241_i32_170 dim 1 : vector<4x256xf32>, i32 -> vector<4x256xf32>
    %c6_171 = arith.constant 6 : index
    %c0_172 = arith.constant 0 : index
    %c0_173 = arith.constant 0 : index
    %345 = vector.load %arg6[%c6_171, %c0_172, %c0_173] : memref<9x1x256xf32, #tpu.memory_space<vmem>>, vector<1x1x256xf32>
    %346 = vector.shape_cast %345 : vector<1x1x256xf32> to vector<1x256xf32>
    %347 = vector.broadcast %346 : vector<1x256xf32> to vector<4x256xf32>
    %348 = arith.mulf %344, %347 : vector<4x256xf32>
    %349 = arith.addf %342, %348 : vector<4x256xf32>
    %350 = vector.extract_strided_slice %304 {offsets = [28, 0], sizes = [4, 256], strides = [1, 1]} : vector<36x256xf32> to vector<4x256xf32>
    %c240_i32_174 = arith.constant 240 : i32
    %351 = tpu.dynamic_rotate %350 by %c240_i32_174 dim 1 : vector<4x256xf32>, i32 -> vector<4x256xf32>
    %c7_175 = arith.constant 7 : index
    %c0_176 = arith.constant 0 : index
    %c0_177 = arith.constant 0 : index
    %352 = vector.load %arg6[%c7_175, %c0_176, %c0_177] : memref<9x1x256xf32, #tpu.memory_space<vmem>>, vector<1x1x256xf32>
    %353 = vector.shape_cast %352 : vector<1x1x256xf32> to vector<1x256xf32>
    %354 = vector.broadcast %353 : vector<1x256xf32> to vector<4x256xf32>
    %355 = arith.mulf %351, %354 : vector<4x256xf32>
    %356 = arith.addf %349, %355 : vector<4x256xf32>
    %357 = vector.extract_strided_slice %304 {offsets = [32, 0], sizes = [4, 256], strides = [1, 1]} : vector<36x256xf32> to vector<4x256xf32>
    %c239_i32_178 = arith.constant 239 : i32
    %358 = tpu.dynamic_rotate %357 by %c239_i32_178 dim 1 : vector<4x256xf32>, i32 -> vector<4x256xf32>
    %c8_179 = arith.constant 8 : index
    %c0_180 = arith.constant 0 : index
    %c0_181 = arith.constant 0 : index
    %359 = vector.load %arg6[%c8_179, %c0_180, %c0_181] : memref<9x1x256xf32, #tpu.memory_space<vmem>>, vector<1x1x256xf32>
    %360 = vector.shape_cast %359 : vector<1x1x256xf32> to vector<1x256xf32>
    %361 = vector.broadcast %360 : vector<1x256xf32> to vector<4x256xf32>
    %362 = arith.mulf %358, %361 : vector<4x256xf32>
    %363 = arith.addf %356, %362 : vector<4x256xf32>
    %364 = arith.mulf %363, %363 : vector<4x256xf32>
    %365 = tpu.concatenate %363, %364 in 0 : vector<4x256xf32>, vector<4x256xf32> -> vector<8x256xf32>
    %cst_182 = arith.constant dense<0.000000e+00> : vector<8xf32>
    %366 = vector.multi_reduction <add>, %365, %cst_182 [1] : vector<8x256xf32> to vector<8xf32>
    %367 = vector.shape_cast %366 : vector<8xf32> to vector<8x1xf32>
    %368 = vector.extract_strided_slice %367 {offsets = [0, 0], sizes = [4, 1], strides = [1, 1]} : vector<8x1xf32> to vector<4x1xf32>
    %cst_183 = arith.constant 3.906250e-03 : f32
    %369 = vector.broadcast %cst_183 : f32 to vector<4x1xf32>
    %370 = arith.mulf %368, %369 : vector<4x1xf32>
    %371 = vector.extract_strided_slice %367 {offsets = [4, 0], sizes = [4, 1], strides = [1, 1]} : vector<8x1xf32> to vector<4x1xf32>
    %cst_184 = arith.constant 3.906250e-03 : f32
    %372 = vector.broadcast %cst_184 : f32 to vector<4x1xf32>
    %373 = arith.mulf %371, %372 : vector<4x1xf32>
    %374 = arith.mulf %370, %370 : vector<4x1xf32>
    %375 = arith.subf %373, %374 : vector<4x1xf32>
    %cst_185 = arith.constant 0.000000e+00 : f32
    %376 = vector.broadcast %cst_185 : f32 to vector<4x1xf32>
    %377 = arith.maximumf %375, %376 : vector<4x1xf32>
    %378 = vector.broadcast %370 : vector<4x1xf32> to vector<4x256xf32>
    %379 = arith.subf %363, %378 : vector<4x256xf32>
    %cst_186 = arith.constant 9.99999974E-6 : f32
    %380 = vector.broadcast %cst_186 : f32 to vector<4x1xf32>
    %381 = arith.addf %377, %380 : vector<4x1xf32>
    %382 = math.rsqrt %381 : vector<4x1xf32>
    %383 = vector.broadcast %382 : vector<4x1xf32> to vector<4x256xf32>
    %384 = arith.mulf %379, %383 : vector<4x256xf32>
    %cst_187 = arith.constant 0.000000e+00 : f32
    %385 = vector.broadcast %cst_187 : f32 to vector<4x256xf32>
    %386 = arith.maximumf %384, %385 : vector<4x256xf32>
    %c0_188 = arith.constant 0 : index
    %c0_189 = arith.constant 0 : index
    %387 = vector.load %arg9[%c0_188, %c0_189] : memref<4x8xbf16, #tpu.memory_space<vmem>>, vector<4x8xbf16>
    %cst_190 = arith.constant dense<0.000000e+00> : vector<4x256xf32>
    %388 = tpu.matmul %387, %217, %cst_190 {dimension_numbers = #tpu.dot_dimension_numbers<[1], [0], [0], [1], [0, 0, 1, 1], [], []>} : vector<4x8xbf16>, vector<8x256xbf16>, vector<4x256xf32> -> vector<4x256xf32>
    %c0_191 = arith.constant 0 : index
    %c0_192 = arith.constant 0 : index
    %389 = vector.load %arg10[%c0_191, %c0_192] : memref<4x1xf32, #tpu.memory_space<vmem>>, vector<4x1xf32>
    %390 = vector.broadcast %389 : vector<4x1xf32> to vector<4x256xf32>
    %391 = arith.addf %388, %390 : vector<4x256xf32>
    %392 = arith.addf %386, %391 : vector<4x256xf32>
    %cst_193 = arith.constant 0.000000e+00 : f32
    %393 = vector.broadcast %cst_193 : f32 to vector<4x256xf32>
    %394 = arith.maximumf %392, %393 : vector<4x256xf32>
    %c1_194 = arith.constant 1 : index
    %c0_195 = arith.constant 0 : index
    %c0_196 = arith.constant 0 : index
    %395 = vector.load %arg11[%c1_194, %c0_195, %c0_196] : memref<2x4x256xf32, #tpu.memory_space<vmem>>, vector<1x4x256xf32>
    %396 = vector.shape_cast %395 : vector<1x4x256xf32> to vector<4x256xf32>
    %397 = vector.shape_cast %394 : vector<4x256xf32> to vector<1x4x256xf32>
    tpu.vector_store %arg11[%c1_194, %c0_195, %c0_196], %397 {strides = array<i32>} : memref<2x4x256xf32, #tpu.memory_space<vmem>>, vector<1x4x256xf32>,
    return
  }
  func.func @transform_0(%arg0: i32) -> (i32, i32, i32) {
    %c0_i32 = arith.constant 0 : i32
    %c0_i32_0 = arith.constant 0 : i32
    %c0_i32_1 = arith.constant 0 : i32
    return %arg0, %c0_i32, %c0_i32_0 : i32, i32, i32
  }
  func.func @transform_1(%arg0: i32) -> (i32, i32, i32) {
    %c0_i32 = arith.constant 0 : i32
    %c0_i32_0 = arith.constant 0 : i32
    %c0_i32_1 = arith.constant 0 : i32
    return %arg0, %c0_i32, %c0_i32_0 : i32, i32, i32
  }
  func.func @transform_2(%arg0: i32) -> (i32, i32) {
    %c0_i32 = arith.constant 0 : i32
    %c0_i32_0 = arith.constant 0 : i32
    %c0_i32_1 = arith.constant 0 : i32
    return %c0_i32, %c0_i32_0 : i32, i32
  }
  func.func @transform_3(%arg0: i32) -> (i32, i32) {
    %c0_i32 = arith.constant 0 : i32
    %c0_i32_0 = arith.constant 0 : i32
    %c0_i32_1 = arith.constant 0 : i32
    return %c0_i32, %c0_i32_0 : i32, i32
  }
  func.func @transform_4(%arg0: i32) -> (i32, i32) {
    %c0_i32 = arith.constant 0 : i32
    %c0_i32_0 = arith.constant 0 : i32
    %c0_i32_1 = arith.constant 0 : i32
    return %c0_i32, %c0_i32_0 : i32, i32
  }
  func.func @transform_5(%arg0: i32) -> (i32, i32, i32) {
    %c0_i32 = arith.constant 0 : i32
    %c0_i32_0 = arith.constant 0 : i32
    %c0_i32_1 = arith.constant 0 : i32
    %c0_i32_2 = arith.constant 0 : i32
    return %c0_i32, %c0_i32_0, %c0_i32_1 : i32, i32, i32
  }
  func.func @transform_6(%arg0: i32) -> (i32, i32) {
    %c0_i32 = arith.constant 0 : i32
    %c0_i32_0 = arith.constant 0 : i32
    %c0_i32_1 = arith.constant 0 : i32
    return %c0_i32, %c0_i32_0 : i32, i32
  }
  func.func @transform_7(%arg0: i32) -> (i32, i32) {
    %c0_i32 = arith.constant 0 : i32
    %c0_i32_0 = arith.constant 0 : i32
    %c0_i32_1 = arith.constant 0 : i32
    return %c0_i32, %c0_i32_0 : i32, i32
  }
  func.func @transform_8(%arg0: i32) -> (i32, i32) {
    %c0_i32 = arith.constant 0 : i32
    %c0_i32_0 = arith.constant 0 : i32
    %c0_i32_1 = arith.constant 0 : i32
    return %c0_i32, %c0_i32_0 : i32, i32
  }
  func.func @transform_9(%arg0: i32) -> (i32, i32) {
    %c0_i32 = arith.constant 0 : i32
    %c0_i32_0 = arith.constant 0 : i32
    %c0_i32_1 = arith.constant 0 : i32
    return %c0_i32, %c0_i32_0 : i32, i32
  }
  func.func @transform_10(%arg0: i32) -> (i32, i32, i32) {
    %c0_i32 = arith.constant 0 : i32
    %c0_i32_0 = arith.constant 0 : i32
    %c0_i32_1 = arith.constant 0 : i32
    return %arg0, %c0_i32, %c0_i32_0 : i32, i32, i32
  }
}

</mosaic_0001>

<bundles_post_ra>
// kernel: upsample_conv_forward.1
= control target key start
LH: loop header
LB: loop body
LE: loop exit
PB: predicated region body
PF: predicated region fallthrough
CT: control target
= control target key end

     0   :  { %vm49_vm0 = vcmask 1041408   ;;  %vm45_vm1 = vcmask 31744   ;;  %s2228_s29 = smov 64   ;;  %vm77_vm2 = vcmask 523264   ;;  %vm375_vm3 = vcmask 1043456   ;;  %s2230_s18 = smov 17   ;;  %s3375_s0 = inlined_call_operand.vmem [shape: bf16[2,4,64], index: 0, kind: input, shape index: {}]   ;;  %s3376_s2 = inlined_call_operand.vmem [shape: bf16[16,4], index: 2, kind: input, shape index: {}]   ;;  %s3377_s4 = inlined_call_operand.vmem [shape: bf16[256,256], index: 4, kind: input, shape index: {}]   ;;  %s3378_s3 = inlined_call_operand.vmem [shape: f32[4,1], index: 3, kind: input, shape index: {}]   ;;  %s3379_s1 = inlined_call_operand.vmem [shape: bf16[2,4,256], index: 1, kind: input, shape index: {}]   ;;  %s3380_s6 = inlined_call_operand.vmem [shape: bf16[36,8], index: 6, kind: input, shape index: {}]   ;;  %s3381_s5 = inlined_call_operand.vmem [shape: f32[9,1,256], index: 5, kind: input, shape index: {}]   ;;  %s3382_s7 = inlined_call_operand.vmem [shape: bf16[36,4], index: 7, kind: input, shape index: {}]   ;;  %s3383_s8 = inlined_call_operand.vmem [shape: bf16[4,8], index: 8, kind: input, shape index: {}]   ;;  %s3384_s9 = inlined_call_operand.vmem [shape: f32[4,1], index: 9, kind: input, shape index: {}]   ;;  %s3385_s10 = inlined_call_operand.vmem [shape: f32[2,4,256], index: 10, kind: output, shape index: {}]  }
   0x1   :  { %v36_v0 = vld [vmem:[%s3375_s0] sm:$0x3]  ;;  %v1844_v3 = vld [vmem:[%s3377_s4 + $0x70] sm:$0xf]  ;;  %v2140_v4 = vld [vmem:[%s3377_s4 + $0x74] sm:$0xf0] }
   0x2   :  { %v51_v1 = vsel %vm49_vm0, %v36_v0, 0  ;;  %v2124_v2 = vld [vmem:[%s3376_s2] sm:$0xff]  ;;  %v1908_v5 = vld [vmem:[%s3377_s4 + $0xf0] sm:$0xf]  ;;  %v1845_v6 = vor.u32 %v2140_v4, %v1844_v3  ;;  %v2156_v7 = vld [vmem:[%s3377_s4 + $0xf4] sm:$0xf0] }
   0x3   :  { %60 = vmatpush.bf16.msra.mxu0 %v51_v1  ;;  %v2139_v8 = vld [vmem:[%s3377_s4 + $0x74] sm:$0xf]  ;;  %v1846_v9 = vld [vmem:[%s3377_s4 + $0x78] sm:$0xf0]  ;;  %v1909_v10 = vor.u32 %v2156_v7, %v1908_v5  ;;  %v1836_v14 = vld [vmem:[%s3377_s4 + $0x60] sm:$0xf] }
   0x4   :  { %v1849_v11 = vor.u32 %v2139_v8, %v1846_v9  ;;  %v2155_v12 = vld [vmem:[%s3377_s4 + $0xf4] sm:$0xf]  ;;  %v1910_v13 = vld [vmem:[%s3377_s4 + $0xf8] sm:$0xf0]  ;;  %280 = vmatpush.bf16.msra.mxu1 %v1845_v6  ;;  %v2138_v16 = vld [vmem:[%s3377_s4 + $0x64] sm:$0xf0] }
   0x5   :  { %v1913_v15 = vor.u32 %v2155_v12, %v1910_v13  ;;  %v1900_v17 = vld [vmem:[%s3377_s4 + $0xe0] sm:$0xf]  ;;  %v2154_v18 = vld [vmem:[%s3377_s4 + $0xe4] sm:$0xf0]  ;;  %293 = vmatpush.bf16.msra.mxu2 %v1909_v10  ;;  %v1837_v19 = vor.u32 %v2138_v16, %v1836_v14  ;;  %v2137_v21 = vld [vmem:[%s3377_s4 + $0x64] sm:$0xf] }
   0x6   :  { %1785 = vmatmul.msk.bf16.vlgmr.msra.gmra.mxu0 %vm45_vm1, %v2124_v2  ;;  %306 = vmatpush.bf16.msra.mxu3 %v1849_v11  ;;  %v1901_v20 = vor.u32 %v2154_v18, %v1900_v17  ;;  %v1838_v22 = vld [vmem:[%s3377_s4 + $0x68] sm:$0xf0]  ;;  %v2153_v23 = vld [vmem:[%s3377_s4 + $0xe4] sm:$0xf]  ;;  %v1828_v26 = vld [vmem:[%s3377_s4 + $0x50] sm:$0xf] }
   0x7   :  { %319 = vmatpush.bf16.msrb.mxu0 %v1913_v15  ;;  %v1841_v24 = vor.u32 %v2137_v21, %v1838_v22  ;;  %v1902_v25 = vld [vmem:[%s3377_s4 + $0xe8] sm:$0xf0]  ;;  %v2136_v27 = vld [vmem:[%s3377_s4 + $0x54] sm:$0xf0]  ;;  %v1892_v29 = vld [vmem:[%s3377_s4 + $0xd0] sm:$0xf] }
   0x8   :  { %v1905_v28 = vor.u32 %v2153_v23, %v1902_v25  ;;  %v2152_v30 = vld [vmem:[%s3377_s4 + $0xd4] sm:$0xf0]  ;;  %v2135_v31 = vld [vmem:[%s3377_s4 + $0x54] sm:$0xf]  ;;  %281 = vmatpush.bf16.msra.mxu1 %v1837_v19  ;;  %v1829_v32 = vor.u32 %v2136_v27, %v1828_v26  ;;  %v1830_v33 = vld [vmem:[%s3377_s4 + $0x58] sm:$0xf0] }
   0x9   :  { %v2151_v34 = vld [vmem:[%s3377_s4 + $0xd4] sm:$0xf]  ;;  %v1894_v35 = vld [vmem:[%s3377_s4 + $0xd8] sm:$0xf0]  ;;  %294 = vmatpush.bf16.msra.mxu2 %v1901_v20  ;;  %v1893_v36 = vor.u32 %v2152_v30, %v1892_v29  ;;  %v1833_v37 = vor.u32 %v2135_v31, %v1830_v33  ;;  %v1820_v38 = vld [vmem:[%s3377_s4 + $0x40] sm:$0xf] }
   0xa   :  { %307 = vmatpush.bf16.msra.mxu3 %v1841_v24  ;;  %v2134_v39 = vld [vmem:[%s3377_s4 + $0x44] sm:$0xf0]  ;;  %v1884_v40 = vld [vmem:[%s3377_s4 + $0xc0] sm:$0xf]  ;;  %v1897_v41 = vor.u32 %v2151_v34, %v1894_v35  ;;  %v2133_v43 = vld [vmem:[%s3377_s4 + $0x44] sm:$0xf] }
   0xb   :  { %320 = vmatpush.bf16.msrb.mxu0 %v1905_v28  ;;  %v2150_v42 = vld [vmem:[%s3377_s4 + $0xc4] sm:$0xf0]  ;;  %v1822_v44 = vld [vmem:[%s3377_s4 + $0x48] sm:$0xf0]  ;;  %v2149_v45 = vld [vmem:[%s3377_s4 + $0xc4] sm:$0xf]  ;;  %v1821_v47 = vor.u32 %v2134_v39, %v1820_v38 }
   0xc   :  { %v1886_v46 = vld [vmem:[%s3377_s4 + $0xc8] sm:$0xf0]  ;;  %282 = vmatpush.bf16.msra.mxu1 %v1829_v32  ;;  %v1885_v48 = vor.u32 %v2150_v42, %v1884_v40  ;;  %v1825_v49 = vor.u32 %v2133_v43, %v1822_v44  ;;  %v1812_v50 = vld [vmem:[%s3377_s4 + $0x30] sm:$0xf]  ;;  %v2132_v51 = vld [vmem:[%s3377_s4 + $0x34] sm:$0xf0] }
   0xd   :  { %295 = vmatpush.bf16.msra.mxu2 %v1893_v36  ;;  %v1876_v52 = vld [vmem:[%s3377_s4 + $0xb0] sm:$0xf]  ;;  %v1889_v53 = vor.u32 %v2149_v45, %v1886_v46  ;;  %v2148_v54 = vld [vmem:[%s3377_s4 + $0xb4] sm:$0xf0]  ;;  %v2131_v55 = vld [vmem:[%s3377_s4 + $0x34] sm:$0xf]  ;;  %v1813_v59 = vor.u32 %v2132_v51, %v1812_v50 }
   0xe   :  { %308 = vmatpush.bf16.msra.mxu3 %v1833_v37  ;;  %v1814_v56 = vld [vmem:[%s3377_s4 + $0x38] sm:$0xf0]  ;;  %v2147_v57 = vld [vmem:[%s3377_s4 + $0xb4] sm:$0xf]  ;;  %v1877_v60 = vor.u32 %v2148_v54, %v1876_v52  ;;  %v1804_v62 = vld [vmem:[%s3377_s4 + $0x20] sm:$0xf] }
   0xf   :  { %321 = vmatpush.bf16.msrb.mxu0 %v1897_v41  ;;  %v1878_v58 = vld [vmem:[%s3377_s4 + $0xb8] sm:$0xf0]  ;;  %v1817_v61 = vor.u32 %v2131_v55, %v1814_v56  ;;  %v2130_v63 = vld [vmem:[%s3377_s4 + $0x24] sm:$0xf0]  ;;  %v1868_v0 = vld [vmem:[%s3377_s4 + $0xa0] sm:$0xf] }
  0x10   :  { %283 = vmatpush.bf16.msra.mxu1 %v1821_v47  ;;  %v1881_v1 = vor.u32 %v2147_v57, %v1878_v58  ;;  %v2146_v2 = vld [vmem:[%s3377_s4 + $0xa4] sm:$0xf0]  ;;  %v2129_v3 = vld [vmem:[%s3377_s4 + $0x24] sm:$0xf]  ;;  %v1806_v4 = vld [vmem:[%s3377_s4 + $0x28] sm:$0xf0]  ;;  %v1805_v8 = vor.u32 %v2130_v63, %v1804_v62 }
  0x11   :  { %296 = vmatpush.bf16.msra.mxu2 %v1885_v48  ;;  %v2145_v5 = vld [vmem:[%s3377_s4 + $0xa4] sm:$0xf]  ;;  %v1870_v6 = vld [vmem:[%s3377_s4 + $0xa8] sm:$0xf0]  ;;  %v1869_v9 = vor.u32 %v2146_v2, %v1868_v0  ;;  %v1809_v10 = vor.u32 %v2129_v3, %v1806_v4  ;;  %v1796_v11 = vld [vmem:[%s3377_s4 + $0x10] sm:$0xf] }
  0x12   :  { %309 = vmatpush.bf16.msra.mxu3 %v1825_v49  ;;  %v2128_v12 = vld [vmem:[%s3377_s4 + $0x14] sm:$0xf0]  ;;  %v1860_v13 = vld [vmem:[%s3377_s4 + $0x90] sm:$0xf]  ;;  %v1873_v14 = vor.u32 %v2145_v5, %v1870_v6  ;;  %v2127_v16 = vld [vmem:[%s3377_s4 + $0x14] sm:$0xf] }
  0x13   :  { %322 = vmatpush.bf16.msrb.mxu0 %v1889_v53  ;;  %v2144_v15 = vld [vmem:[%s3377_s4 + $0x94] sm:$0xf0]  ;;  %v1798_v17 = vld [vmem:[%s3377_s4 + $0x18] sm:$0xf0]  ;;  %v2143_v18 = vld [vmem:[%s3377_s4 + $0x94] sm:$0xf]  ;;  %v1797_v20 = vor.u32 %v2128_v12, %v1796_v11 }
  0x14   :  { %284 = vmatpush.bf16.msra.mxu1 %v1813_v59  ;;  %v1862_v19 = vld [vmem:[%s3377_s4 + $0x98] sm:$0xf0]  ;;  %v1861_v21 = vor.u32 %v2144_v15, %v1860_v13  ;;  %v1801_v22 = vor.u32 %v2127_v16, %v1798_v17  ;;  %v1788_v28 = vld [vmem:[%s3377_s4] sm:$0xf]  ;;  %v2126_v29 = vld [vmem:[%s3377_s4 + $0x4] sm:$0xf0] }
  0x15   :  { %297 = vmatpush.bf16.msra.mxu2 %v1877_v60  ;;  %v1865_v23 = vor.u32 %v2143_v18, %v1862_v19  ;;  %v1852_v30 = vld [vmem:[%s3377_s4 + $0x80] sm:$0xf]  ;;  %v1789_v31 = vor.u32 %v2126_v29, %v1788_v28  ;;  %v2142_v32 = vld [vmem:[%s3377_s4 + $0x84] sm:$0xf0]  ;;  %v2125_v33 = vld [vmem:[%s3377_s4 + $0x4] sm:$0xf] }
  0x16   :  { %310 = vmatpush.bf16.msra.mxu3 %v1817_v61  ;;  %v1790_v34 = vld [vmem:[%s3377_s4 + $0x8] sm:$0xf0]  ;;  %v1853_v35 = vor.u32 %v2142_v32, %v1852_v30  ;;  %v2141_v37 = vld [vmem:[%s3377_s4 + $0x84] sm:$0xf]  ;;  %v114_v40 = vld [vmem:[%s3378_s3] sm:$0xf] }
  0x17   :  { %323 = vmatpush.bf16.msrb.mxu0 %v1881_v1  ;;  %v1793_v36 = vor.u32 %v2125_v33, %v1790_v34  ;;  %v1854_v38 = vld [vmem:[%s3377_s4 + $0x88] sm:$0xf0]  ;;  %v2229_v41 = vmov 0   ;;  %v37_v49 = vld [vmem:[%s3379_s1] sm:$0xf]  ;;  %vm365_vm4 = vcmask 64512  }
  0x18   :  { %285 = vmatpush.bf16.msra.mxu1 %v1805_v8  ;;  %v1857_v39 = vor.u32 %v2141_v37, %v1854_v38  ;;  %2213 = vset.pattern.permute.xlu0 %v2229_v41  ;;  %340 = vst [vmem:[#allocation1 + $0x1] ss:$4 sm:$0xff] %v37_v49  ;;  %v1952_v52 = vld [vmem:[%s3379_s1 + $0x4] sm:$0xf]  ;;  %v2158_v12 = vld [vmem:[%s3380_s6 + $0x8] sm:$0xff]  ;;  %s2231_s19 = smov 16  }
  0x19   :  { %298 = vmatpush.bf16.msra.mxu2 %v1869_v9  ;;  %2214 = vset.pattern.permute.xlu2 %v2229_v41  ;;  %v2157_v11 = vld [vmem:[%s3380_s6] sm:$0xff]  ;;  %v351_v13 = vld [vmem:[%s3380_s6 + $0x10] sm:$0x3]  ;;  %s2232_s20 = smov 1   ;;  %s2233_s21 = smov 15  }
  0x1a   :  { %311 = vmatpush.bf16.msra.mxu3 %v1809_v10  ;;  %s2234_s22 = smov 127   ;;  %s2235_s23 = smov 113  }
  0x1b   :  { %324 = vmatpush.bf16.msrb.mxu0 %v1873_v14  ;;  %v361_v14 = vunpack.c.l.b16 %v351_v13  ;;  %s2236_s24 = smov 112   ;;  %s2237_s25 = smov 111  }
  0x1c   :  { %286 = vmatpush.bf16.msra.mxu1 %v1797_v20 }
  0x1d   :  { %299 = vmatpush.bf16.msra.mxu2 %v1861_v21  ;;  %v364_v15 = vpack.c.b16 %v361_v14, %v361_v14 }
  0x1e   :  { %312 = vmatpush.bf16.msra.mxu3 %v1801_v22 }
  0x1f   :  { %325 = vmatpush.bf16.msrb.mxu0 %v1865_v23  ;;  %v341_v50 = vld.sshfl [vmem:[#allocation1] sm:$0xff pattern:$0x73625140]  ;;  %v342_v51 = vld.sshfl [vmem:[#allocation1 + $0x8] sm:$0xff pattern:$0x73625140] }
  0x20   :  { %287 = vmatpush.bf16.msra.mxu1 %v1789_v31  ;;  %1219 = vst [vmem:[#allocation1 + $0x1] ss:$4 sm:$0xff] %v1952_v52 }
  0x21   :  { %300 = vmatpush.bf16.msra.mxu2 %v1853_v35 }
  0x22   :  { %313 = vmatpush.bf16.msra.mxu3 %v1793_v36 }
  0x23   :  { %326 = vmatpush.bf16.msrb.mxu0 %v1857_v39 }
  0x83   :  { %v62_v7 = vpop.f32.mrf.mxu0 }
  0x84   :  { %v68_v25 = vrot.slane %v62_v7, 4 }
  0x8b   :  { %v64_v24 = vpop.f32.mrf.mxu0 }
  0x8c   :  { %v73_v26 = vrot.slane %v64_v24, 4 }
  0x8e   :  { %v2208_v27 = vpack.i.bf16 %v73_v26, %v68_v25 }
  0x90   :  { %2209 = vrot.lane.b32.xlu0 %v2208_v27, %s2228_s29 }
  0x98   :  { %117 = vperm.xlu0 %2213, %v114_v40   ;;  %v430_v40 = vlaneseq }
 0x102   :  { %v2210_v42 = vpop.permute.xlu0 %2209 }
 0x103   :  { %v2212_v43 = vunpack.i.h.bf16 %v2210_v42  ;;  %v2211_v44 = vunpack.i.l.bf16 %v2210_v42  ;;  %v2546_v42 = vand.u32 127, %v430_v40 }
 0x105   :  { %v78_v45 = vsel %vm77_vm2, %v62_v7, %v2211_v44  ;;  %v79_v46 = vsel %vm77_vm2, %v64_v24, %v2212_v43  ;;  %v2551_v43 = vld [vmem:[%s3381_s5] sm:$0x3]  ;;  %v2556_v44 = vld [vmem:[%s3381_s5 + $0x2] sm:$0x3]  ;;  %vm432_vm5 = vcmp.lt.s32.totalorder %v2546_v42, 17  ;;  %vm455_vm6 = vcmp.lt.s32.totalorder %v2546_v42, 16 }
 0x106   :  { %v80_v47 = vpack.c.bf16 %v78_v45, %v78_v45  ;;  %v81_v48 = vpack.c.bf16 %v79_v46, %v79_v46  ;;  %v438_v49 = vperm.slane %v2551_v43, 1  ;;  %vm473_vm7 = vcmp.lt.s32.totalorder %v2546_v42, 15 }
 0x107   :  { %vm497_vm8 = vcmp.lt.s32.totalorder %v2546_v42, 1  ;;  %vm523_vm9 = vcmp.lt.s32.totalorder %v2546_v42, 127  ;;  %vm541_vm10 = vcmp.lt.s32.totalorder %v2546_v42, 113  ;;  %vm565_vm11 = vcmp.lt.s32.totalorder %v2546_v42, 112 }
 0x108   :  { %288 = vmatmul.bf16.vlgmr.msra.gmra.mxu1 %v80_v47  ;;  %301 = vmatmul.bf16.vlgmr.msra.gmra.mxu2 %v81_v48  ;;  %vm583_vm12 = vcmp.lt.s32.totalorder %v2546_v42, 111 }
 0x109   :  { %314 = vmatmul.bf16.vlgmr.msra.gmra.mxu3 %v80_v47  ;;  %327 = vmatmul.bf16.vlgmr.msrb.gmra.mxu0 %v81_v48  ;;  %v2563_v47 = vld [vmem:[%s3381_s5 + $0x4] sm:$0x3]  ;;  %v437_v48 = vperm.slane %v2551_v43, 0  ;;  %v1504_v43 = vld [vmem:[%s3382_s7 + $0x10] sm:$0x3] }
 0x10a   :  { %v118_v55 = vpop.permute.xlu0 %117 }
 0x185   :  { %v289_v53 = vpop.f32.mrf.mxu1 }
 0x186   :  { %v328_v54 = vpop.f32.mrf.mxu0  ;;  %v290_v58 = vadd.f32 %v289_v53, %v118_v55  ;;  %v2576_v53 = vld [vmem:[%s3381_s5 + $0x6] sm:$0x3] }
 0x18b   :  { %v302_v56 = vpop.f32.mrf.mxu2 }
 0x18c   :  { %v315_v57 = vpop.f32.mrf.mxu3  ;;  %v303_v62 = vadd.f32 %v302_v56, %v290_v58  ;;  %v480_v58 = vperm.slane %v2563_v47, 1 }
 0x18d   :  { %v316_v59 = vadd.f32 %v315_v57, %v118_v55  ;;  %v291_v60 = vpop.f32.mrf.mxu1  ;;  %v479_v57 = vperm.slane %v2563_v47, 0 }
 0x18e   :  { %v330_v61 = vpop.f32.mrf.mxu0 }
 0x18f   :  { %v329_v63 = vadd.f32 %v328_v54, %v316_v59  ;;  %v462_v54 = vperm.slane %v2556_v44, 1 }
 0x191   :  { %v332_v0 = vpack.c.bf16 %v329_v63, %v303_v62 }
 0x193   :  { %v304_v1 = vpop.f32.mrf.mxu2  ;;  %v334_v2 = vunpack.c.l.b16 %v332_v0  ;;  %v335_v3 = vunpack.c.h.b16 %v332_v0  ;;  %v503_v0 = vperm.slane %v2576_v53, 0 }
 0x194   :  { %v317_v4 = vpop.f32.mrf.mxu3  ;;  %v504_v1 = vperm.slane %v2576_v53, 1 }
 0x195   :  { %v336_v5 = vpack.c.b16 %v334_v2, %v334_v2  ;;  %v337_v6 = vpack.c.b16 %v335_v3, %v335_v3 }
 0x197   :  { %v344_v7 = vsel %vm49_vm0, %v336_v5, %v341_v50  ;;  %v346_v8 = vsel %vm49_vm0, %v337_v6, %v342_v51  ;;  %v461_v50 = vperm.slane %v2556_v44, 0 }
 0x198   :  { %v376_v9 = vsel %vm375_vm3, %v344_v7, 0  ;;  %v378_v10 = vsel %vm375_vm3, %v346_v8, 0 }
 0x199   :  { %387 = vmatpush.bf16.msrb.mxu1 %v376_v9  ;;  %410 = vmatpush.bf16.msrb.mxu2 %v378_v10 }
 0x19c   :  { %1922 = vmatmul.msk.bf16.vlgmr.msrb.gmra.mxu1 %vm365_vm4, %v2157_v11  ;;  %1925 = vmatmul.msk.bf16.vlgmr.msrb.gmra.mxu2 %vm365_vm4, %v2157_v11 }
 0x19d   :  { %887 = vmatpush.bf16.msra.mxu1 %v376_v9  ;;  %900 = vmatpush.bf16.msra.mxu2 %v378_v10 }
 0x1ac   :  { %1923 = vmatmul.msk.bf16.gmra.mxu1 %vm365_vm4, %v2158_v12  ;;  %1926 = vmatmul.msk.bf16.gmra.mxu2 %vm365_vm4, %v2158_v12 }
 0x1bc   :  { %1927 = vmatmul.msk.bf16.gmra.mxu2 %vm365_vm4, %v364_v15  ;;  %1924 = vmatmul.msk.bf16.gmra.mxu1 %vm365_vm4, %v364_v15 }
 0x219   :  { %v389_v16 = vpop.f32.mrf.mxu1 }
 0x21a   :  { %426 = vrot.lane.b32.xlu1 %v389_v16, %s2230_s18  ;;  %v447_v17 = vrot.slane %v389_v16, 4  ;;  %v2615_v16 = vld [vmem:[%s3381_s5 + $0xa] sm:$0x3] }
 0x21c   :  { %451 = vrot.lane.b32.xlu2 %v447_v17, %s2231_s19  ;;  %v2620_v17 = vld [vmem:[%s3381_s5 + $0xc] sm:$0x3] }
 0x21f   :  { %v412_v18 = vpop.f32.mrf.mxu2 }
 0x220   :  { %v448_v19 = vrot.slane %v412_v18, 4 }
 0x221   :  { %v391_v20 = vpop.f32.mrf.mxu1 }
 0x222   :  { %v489_v21 = vrot.slane %v391_v20, 4  ;;  %428 = vrot.lane.b32.xlu1 %v412_v18, %s2230_s18 }
 0x224   :  { %453 = vrot.lane.b32.xlu2 %v448_v19, %s2231_s19  ;;  %493 = vrot.lane.b32.xlu0 %v489_v21, %s2232_s20  ;;  %v529_v21 = vperm.slane %v2615_v16, 0 }
 0x227   :  { %v414_v22 = vpop.f32.mrf.mxu2 }
 0x228   :  { %v490_v25 = vrot.slane %v414_v22, 4 }
 0x229   :  { %v2529_v23 = vpop.f32.mrf.mxu1 }
 0x22a   :  { %469 = vrot.lane.b32.xlu1 %v391_v20, %s2233_s21  ;;  %v515_v26 = vrot.slane %v2529_v23, 4 }
 0x22c   :  { %471 = vrot.lane.b32.xlu2 %v414_v22, %s2233_s21  ;;  %v530_v22 = vperm.slane %v2615_v16, 1 }
 0x22f   :  { %v2533_v24 = vpop.f32.mrf.mxu2 }
 0x230   :  { %v516_v27 = vrot.slane %v2533_v24, 4 }
 0x231   :  { %v396_v28 = vpop.f32.mrf.mxu1 }
 0x232   :  { %495 = vrot.lane.b32.xlu1 %v490_v25, %s2232_s20  ;;  %521 = vrot.lane.b32.xlu0 %v516_v27, %s2234_s22  ;;  %v557_v30 = vrot.slane %v396_v28, 4  ;;  %v3403_v25 = vperm.slane %v2620_v17, 0 }
 0x234   :  { %519 = vrot.lane.b32.xlu2 %v515_v26, %s2234_s22  ;;  %v3392_v26 = vperm.slane %v2620_v17, 1 }
 0x237   :  { %v419_v29 = vpop.f32.mrf.mxu2 }
 0x238   :  { %v558_v33 = vrot.slane %v419_v29, 4 }
 0x239   :  { %v399_v31 = vpop.f32.mrf.mxu1 }
 0x23a   :  { %537 = vrot.lane.b32.xlu1 %v396_v28, %s2235_s23  ;;  %561 = vrot.lane.b32.xlu0 %v557_v30, %s2236_s24 }
 0x23c   :  { %539 = vrot.lane.b32.xlu2 %v419_v29, %s2235_s23 }
 0x23f   :  { %v422_v32 = vpop.f32.mrf.mxu2 }
 0x241   :  { %v401_v34 = vpop.f32.mrf.mxu1 }
 0x242   :  { %563 = vrot.lane.b32.xlu1 %v558_v33, %s2236_s24  ;;  %581 = vrot.lane.b32.xlu0 %v422_v32, %s2237_s25 }
 0x244   :  { %579 = vrot.lane.b32.xlu2 %v399_v31, %s2237_s25 }
 0x247   :  { %v424_v35 = vpop.f32.mrf.mxu2 }
 0x248   :  { %v2641_v35 = vld [vmem:[%s3381_s5 + $0xe] sm:$0x3] }
 0x249   :  { %v3390_v40 = vperm.slane %v2641_v35, 1 }
 0x276   :  { %v452_v36 = vpop.permute.xlu2 %451 }
 0x27e   :  { %v454_v37 = vpop.permute.xlu2 %453 }
 0x27f   :  { %v456_v55 = vsel %vm455_vm6, %v452_v36, %v454_v37  ;;  %v457_v59 = vsel %vm455_vm6, %v454_v37, %v452_v36  ;;  %v2646_v36 = vld [vmem:[%s3381_s5 + $0x10] sm:$0x3] }
 0x280   :  { %v465_v2 = vmul.f32 %v461_v50, %v457_v59  ;;  %v466_v3 = vmul.f32 %v462_v54, %v456_v55 }
 0x286   :  { %v472_v41 = vpop.permute.xlu2 %471 }
 0x28c   :  { %v427_v38 = vpop.permute.xlu1 %426 }
 0x28e   :  { %v520_v56 = vpop.permute.xlu2 %519 }
 0x294   :  { %v429_v39 = vpop.permute.xlu1 %428 }
 0x295   :  { %v433_v51 = vsel %vm432_vm5, %v427_v38, %v429_v39  ;;  %v434_v52 = vsel %vm432_vm5, %v429_v39, %v427_v38  ;;  %v3391_v39 = vperm.slane %v2641_v35, 0 }
 0x296   :  { %v494_v45 = vpop.permute.xlu0 %493  ;;  %v441_v62 = vmul.f32 %v437_v48, %v434_v52  ;;  %v442_v63 = vmul.f32 %v438_v49, %v433_v51  ;;  %v540_v18 = vpop.permute.xlu2 %539  ;;  %v3386_v51 = vperm.slane %v2646_v36, 1 }
 0x298   :  { %v467_v10 = vadd.f32 %v465_v2, %v441_v62  ;;  %v468_v11 = vadd.f32 %v466_v3, %v442_v63 }
 0x29c   :  { %v470_v46 = vpop.permute.xlu1 %469 }
 0x29d   :  { %v474_v60 = vsel %vm473_vm7, %v470_v46, %v472_v41  ;;  %v475_v61 = vsel %vm473_vm7, %v472_v41, %v470_v46  ;;  %v3387_v46 = vperm.slane %v2646_v36, 0 }
 0x29e   :  { %v483_v4 = vmul.f32 %v479_v57, %v475_v61  ;;  %v484_v5 = vmul.f32 %v480_v58, %v474_v60  ;;  %v580_v52 = vpop.permute.xlu2 %579 }
 0x2a0   :  { %v485_v14 = vadd.f32 %v483_v4, %v467_v10  ;;  %v486_v15 = vadd.f32 %v484_v5, %v468_v11 }
 0x2a4   :  { %v496_v6 = vpop.permute.xlu1 %495  ;;  %v522_v7 = vpop.permute.xlu0 %521 }
 0x2a5   :  { %v498_v8 = vsel %vm497_vm8, %v494_v45, %v496_v6  ;;  %v499_v9 = vsel %vm497_vm8, %v496_v6, %v494_v45  ;;  %v524_v29 = vsel %vm523_vm9, %v520_v56, %v522_v7  ;;  %v525_v30 = vsel %vm523_vm9, %v522_v7, %v520_v56 }
 0x2a6   :  { %v507_v12 = vmul.f32 %v503_v0, %v499_v9  ;;  %v508_v13 = vmul.f32 %v504_v1, %v498_v8  ;;  %v533_v37 = vmul.f32 %v529_v21, %v524_v29  ;;  %v534_v38 = vmul.f32 %v530_v22, %v525_v30 }
 0x2a8   :  { %v509_v19 = vadd.f32 %v507_v12, %v485_v14  ;;  %v510_v20 = vadd.f32 %v508_v13, %v486_v15 }
 0x2aa   :  { %v512_v33 = vadd.f32 %v510_v20, %v2533_v24  ;;  %v511_v34 = vadd.f32 %v509_v19, %v2529_v23 }
 0x2ac   :  { %v538_v27 = vpop.permute.xlu1 %537  ;;  %v562_v28 = vpop.permute.xlu0 %561  ;;  %v535_v41 = vadd.f32 %v533_v37, %v511_v34  ;;  %v536_v45 = vadd.f32 %v534_v38, %v512_v33 }
 0x2ad   :  { %v542_v31 = vsel %vm541_vm10, %v538_v27, %v540_v18  ;;  %v543_v32 = vsel %vm541_vm10, %v540_v18, %v538_v27 }
 0x2ae   :  { %v551_v24 = vmul.f32 %v3403_v25, %v542_v31  ;;  %v552_v23 = vmul.f32 %v3392_v26, %v543_v32 }
 0x2b0   :  { %v553_v55 = vadd.f32 %v551_v24, %v535_v41  ;;  %v554_v56 = vadd.f32 %v552_v23, %v536_v45  ;;  %v993_v45 = vld [vmem:[%s3378_s3] sm:$0xf] }
 0x2b4   :  { %v564_v59 = vpop.permute.xlu1 %563  ;;  %v582_v60 = vpop.permute.xlu0 %581 }
 0x2b5   :  { %v566_v61 = vsel %vm565_vm11, %v562_v28, %v564_v59  ;;  %v567_v62 = vsel %vm565_vm11, %v564_v59, %v562_v28  ;;  %v584_v63 = vsel %vm583_vm12, %v580_v52, %v582_v60  ;;  %v585_v2 = vsel %vm583_vm12, %v582_v60, %v580_v52 }
 0x2b6   :  { %v575_v3 = vmul.f32 %v3391_v39, %v566_v61  ;;  %v576_v4 = vmul.f32 %v3390_v40, %v567_v62  ;;  %v593_v5 = vmul.f32 %v3387_v46, %v584_v63  ;;  %v594_v6 = vmul.f32 %v3386_v51, %v585_v2  ;;  %v1951_v62 = vld [vmem:[%s3375_s0 + $0x2] sm:$0x3] }
 0x2b8   :  { %v577_v7 = vadd.f32 %v575_v3, %v553_v55  ;;  %v578_v8 = vadd.f32 %v576_v4, %v554_v56 }
 0x2ba   :  { %v595_v9 = vadd.f32 %v593_v5, %v577_v7  ;;  %v596_v10 = vadd.f32 %v594_v6, %v578_v8  ;;  %v931_v5 = vsel %vm49_vm0, %v1951_v62, 0  ;;  %v2159_v8 = vld [vmem:[%s3382_s7] sm:$0xff] }
 0x2bb   :  { %v2190_v62 = vld [vmem:[%s3377_s4 + $0xe4] sm:$0xf] }
 0x2bc   :  { %v597_v11 = vmul.f32 %v595_v9, %v595_v9  ;;  %v598_v12 = vmul.f32 %v596_v10, %v596_v10 }
 0x2be   :  { %v601_v13 = vrot.slane %v597_v11, 4  ;;  %v602_v14 = vrot.slane %v598_v12, 4 }
 0x2c0   :  { %v605_v15 = vsel %vm375_vm3, %v595_v9, %v601_v13  ;;  %v606_v18 = vsel %vm375_vm3, %v596_v10, %v602_v14  ;;  %v2161_v13 = vld [vmem:[%s3376_s2] sm:$0xff] }
 0x2c1   :  { %v607_v19 = vadd.f32 %v606_v18, %v605_v15 }
 0x2c3   :  { %608 = vadd.xlane.f32.xlu1 %v607_v19 }
 0x336   :  { %v609_v20 = vpop.xlane.xlu1 %608 }
 0x337   :  { %v610_v27 = vmul.f32 0.00390625, %v609_v20  ;;  %v2016_v20 = vld [vmem:[%s3377_s4 + $0x70] sm:$0xf] }
 0x339   :  { %v611_v28 = vmul.f32 %v610_v27, %v610_v27  ;;  %v617_v55 = vsub.f32 %v595_v9, %v610_v27  ;;  %v618_v56 = vsub.f32 %v596_v10, %v610_v27  ;;  %v2160_v9 = vld [vmem:[%s3382_s7 + $0x8] sm:$0xff]  ;;  %v644_v10 = vld [vmem:[%s3382_s7 + $0x10] sm:$0x3] }
 0x33a   :  { %v656_v11 = vunpack.c.l.b16 %v644_v10  ;;  %v2172_v10 = vld [vmem:[%s3377_s4 + $0x54] sm:$0xf] }
 0x33b   :  { %v613_v29 = vrot.slane %v611_v28, 4  ;;  %v2080_v28 = vld [vmem:[%s3377_s4 + $0xf0] sm:$0xf] }
 0x33c   :  { %v659_v12 = vpack.c.b16 %v656_v11, %v656_v11  ;;  %v2002_v11 = vld [vmem:[%s3377_s4 + $0x58] sm:$0xf0] }
 0x33d   :  { %v615_v30 = vsub.f32 %v610_v27, %v613_v29  ;;  %v2177_v27 = vld [vmem:[%s3377_s4 + $0x74] sm:$0xf0] }
 0x33e   :  { %v2017_v29 = vor.u32 %v2177_v27, %v2016_v20  ;;  %v2005_v20 = vor.u32 %v2172_v10, %v2002_v11  ;;  %v2066_v27 = vld [vmem:[%s3377_s4 + $0xd8] sm:$0xf0]  ;;  %v2183_v11 = vld [vmem:[%s3377_s4 + $0xa4] sm:$0xf0] }
 0x33f   :  { %v616_v31 = vmax.f32 %v615_v30, 0.0  ;;  %v2193_v30 = vld [vmem:[%s3377_s4 + $0xf4] sm:$0xf0] }
 0x341   :  { %v619_v32 = vadd.f32 1e-05, %v616_v31  ;;  %v2176_v31 = vld [vmem:[%s3377_s4 + $0x74] sm:$0xf] }
 0x343   :  { %2220 = vrsqrt.f32 %v619_v32  ;;  %vm626_vm14 = vweird.f32 %v619_v32 }
 0x349   :  { %v2221_v33 = vpop.eup %2220 }
 0x34a   :  { %v621_v34 = vmul.f32 %v2221_v33, %v619_v32  ;;  %vm627_vm13 = vweird.f32 %v2221_v33  ;;  %v2018_v32 = vld [vmem:[%s3377_s4 + $0x78] sm:$0xf0] }
 0x34b   :  { %vm628_vm15 = vmor %vm626_vm14, %vm627_vm13 }
 0x34c   :  { %v622_v37 = vmul.f32 %v2221_v33, %v621_v34  ;;  %v2021_v34 = vor.u32 %v2176_v31, %v2018_v32  ;;  %v2056_v31 = vld [vmem:[%s3377_s4 + $0xc0] sm:$0xf]  ;;  %v2187_v32 = vld [vmem:[%s3377_s4 + $0xc4] sm:$0xf0] }
 0x34e   :  { %v623_v38 = vmul.f32 0.5, %v622_v37  ;;  %v2192_v37 = vld [vmem:[%s3377_s4 + $0xf4] sm:$0xf]  ;;  %1185 = vmatpush.bf16.msrb.mxu2 %v2021_v34  ;;  %v1994_v34 = vld [vmem:[%s3377_s4 + $0x48] sm:$0xf0] }
 0x350   :  { %v624_v24 = vsub.f32 1.5, %v623_v38  ;;  %v2082_v38 = vld [vmem:[%s3377_s4 + $0xf8] sm:$0xf0] }
 0x352   :  { %v625_v23 = vmul.f32 %v2221_v33, %v624_v24  ;;  %v2008_v24 = vld [vmem:[%s3377_s4 + $0x60] sm:$0xf] }
 0x354   :  { %v629_v41 = vsel %vm628_vm15, %v2221_v33, %v625_v23  ;;  %v2081_v33 = vor.u32 %v2193_v30, %v2080_v28  ;;  %v1992_v28 = vld [vmem:[%s3377_s4 + $0x40] sm:$0xf] }
 0x355   :  { %632 = vperm.xlu2 %2214, %v629_v41   ;;  %v2085_v41 = vor.u32 %v2192_v37, %v2082_v38  ;;  %v2186_v37 = vld [vmem:[%s3377_s4 + $0xc4] sm:$0xf]  ;;  %v2058_v38 = vld [vmem:[%s3377_s4 + $0xc8] sm:$0xf0] }
 0x356   :  { %1172 = vmatpush.bf16.msrb.mxu1 %v2081_v33  ;;  %v2170_v33 = vld [vmem:[%s3377_s4 + $0x44] sm:$0xf] }
 0x35d   :  { %996 = vperm.xlu2 %2214, %v993_v45   ;;  %v2175_v45 = vld [vmem:[%s3377_s4 + $0x64] sm:$0xf0] }
 0x3af   :  { %v633_v52 = vpop.permute.xlu2 %632 }
 0x3b0   :  { %v634_v59 = vrot.slane %v633_v52, 4  ;;  %v2072_v52 = vld [vmem:[%s3377_s4 + $0xe0] sm:$0xf] }
 0x3b2   :  { %v636_v60 = vmul.f32 %v634_v59, %v617_v55  ;;  %v637_v61 = vmul.f32 %v634_v59, %v618_v56  ;;  %v2191_v55 = vld [vmem:[%s3377_s4 + $0xe4] sm:$0xf0]  ;;  %v2009_v56 = vor.u32 %v2175_v45, %v2008_v24  ;;  %v2057_v45 = vor.u32 %v2187_v32, %v2056_v31  ;;  %v1968_v32 = vld [vmem:[%s3377_s4 + $0x10] sm:$0xf] }
 0x3b3   :  { %v2073_v59 = vor.u32 %v2191_v55, %v2072_v52  ;;  %v1997_v52 = vor.u32 %v2170_v33, %v1994_v34  ;;  %v1984_v55 = vld [vmem:[%s3377_s4 + $0x30] sm:$0xf]  ;;  %v2165_v33 = vld [vmem:[%s3377_s4 + $0x14] sm:$0xf0] }
 0x3b4   :  { %v639_v63 = vmax.f32 %v637_v61, 0.0  ;;  %v638_v2 = vmax.f32 %v636_v60, 0.0  ;;  %v2174_v60 = vld [vmem:[%s3377_s4 + $0x64] sm:$0xf]  ;;  %v2010_v61 = vld [vmem:[%s3377_s4 + $0x68] sm:$0xf0] }
 0x3b5   :  { %1173 = vmatpush.bf16.msrb.mxu1 %v2073_v59  ;;  %v2048_v59 = vld [vmem:[%s3377_s4 + $0xb0] sm:$0xf] }
 0x3b6   :  { %v646_v3 = vpack.c.bf16 %v639_v63, %v639_v63  ;;  %v645_v4 = vpack.c.bf16 %v638_v2, %v638_v2  ;;  %v2013_v63 = vor.u32 %v2174_v60, %v2010_v61  ;;  %v2074_v2 = vld [vmem:[%s3377_s4 + $0xe8] sm:$0xf0]  ;;  %v2061_v60 = vor.u32 %v2186_v37, %v2058_v38  ;;  %v2185_v61 = vld [vmem:[%s3377_s4 + $0xb4] sm:$0xf0]  ;;  %v2032_v34 = vld [vmem:[%s3377_s4 + $0x90] sm:$0xf] }
 0x3b7   :  { %v2181_v38 = vld [vmem:[%s3377_s4 + $0x94] sm:$0xf0] }
 0x3b8   :  { %v670_v6 = vsel %vm49_vm0, %v645_v4, 0  ;;  %v673_v7 = vsel %vm49_vm0, %v646_v3, 0  ;;  %v870_v3 = vld [vmem:[%s3383_s8] sm:$0x3]  ;;  %v2000_v4 = vld [vmem:[%s3377_s4 + $0x50] sm:$0xf]  ;;  %1186 = vmatpush.bf16.msrb.mxu2 %v2013_v63 }
 0x3b9   :  { %682 = vmatpush.bf16.msrb.mxu3 %v670_v6  ;;  %705 = vmatpush.bf16.msra.mxu0 %v673_v7  ;;  %v2173_v6 = vld [vmem:[%s3377_s4 + $0x54] sm:$0xf0]  ;;  %v2064_v7 = vld [vmem:[%s3377_s4 + $0xd0] sm:$0xf]  ;;  %v1986_v63 = vld [vmem:[%s3377_s4 + $0x38] sm:$0xf0] }
 0x3ba   :  { %1950 = vmatmul.msk.bf16.vlgmr.msra.gmra.mxu2 %vm365_vm4, %v870_v3  ;;  %1949 = vmatmul.msk.bf16.vlgmr.msra.gmra.mxu1 %vm365_vm4, %v870_v3  ;;  %v2050_v3 = vld [vmem:[%s3377_s4 + $0xb8] sm:$0xf0] }
 0x3bc   :  { %1943 = vmatmul.msk.bf16.vlgmr.msrb.gmra.mxu3 %vm45_vm1, %v2159_v8  ;;  %1946 = vmatmul.msk.bf16.vlgmr.msra.gmra.mxu0 %vm45_vm1, %v2159_v8  ;;  %v2189_v8 = vld [vmem:[%s3377_s4 + $0xd4] sm:$0xf0] }
 0x3bd   :  { %940 = vmatpush.bf16.msra.mxu3 %v931_v5  ;;  %1159 = vmatpush.bf16.msrb.mxu0 %v2017_v29  ;;  %v2077_v5 = vor.u32 %v2190_v62, %v2074_v2  ;;  %v2171_v29 = vld [vmem:[%s3377_s4 + $0x44] sm:$0xf0]  ;;  %v2168_v62 = vld [vmem:[%s3377_s4 + $0x34] sm:$0xf] }
 0x3be   :  { %1187 = vmatpush.bf16.msrb.mxu2 %v2005_v20  ;;  %v2184_v2 = vld [vmem:[%s3377_s4 + $0xb4] sm:$0xf]  ;;  %v2182_v20 = vld [vmem:[%s3377_s4 + $0xa4] sm:$0xf] }
 0x3bf   :  { %v2053_v10 = vor.u32 %v2184_v2, %v2050_v3  ;;  %v1960_v3 = vld [vmem:[%s3377_s4] sm:$0xf] }
 0x3c1   :  { %1198 = vmatpush.bf16.msrb.mxu3 %v2085_v41  ;;  %1160 = vmatpush.bf16.msrb.mxu0 %v2009_v56  ;;  %v1993_v41 = vor.u32 %v2171_v29, %v1992_v28  ;;  %v2169_v56 = vld [vmem:[%s3377_s4 + $0x34] sm:$0xf0] }
 0x3c2   :  { %1188 = vmatpush.bf16.msrb.mxu2 %v1997_v52  ;;  %v2034_v52 = vld [vmem:[%s3377_s4 + $0x98] sm:$0xf0] }
 0x3c5   :  { %1199 = vmatpush.bf16.msrb.mxu3 %v2077_v5  ;;  %v2049_v5 = vor.u32 %v2185_v61, %v2048_v59 }
 0x3cc   :  { %1944 = vmatmul.msk.bf16.gmra.mxu3 %vm45_vm1, %v2160_v9  ;;  %1947 = vmatmul.msk.bf16.gmra.mxu0 %vm45_vm1, %v2160_v9  ;;  %v2001_v9 = vor.u32 %v2173_v6, %v2000_v4  ;;  %v1985_v4 = vor.u32 %v2169_v56, %v1984_v55  ;;  %v1989_v6 = vor.u32 %v2168_v62, %v1986_v63 }
 0x3cd   :  { %v1969_v55 = vor.u32 %v2165_v33, %v1968_v32  ;;  %v2033_v56 = vor.u32 %v2181_v38, %v2032_v34 }
 0x3ce   :  { %1161 = vmatpush.bf16.msrb.mxu0 %v2001_v9  ;;  %v2040_v9 = vld [vmem:[%s3377_s4 + $0xa0] sm:$0xf]  ;;  %1189 = vmatpush.bf16.msrb.mxu2 %v1989_v6 }
 0x3d2   :  { %1162 = vmatpush.bf16.msrb.mxu0 %v1993_v41  ;;  %v1970_v41 = vld [vmem:[%s3377_s4 + $0x18] sm:$0xf0] }
 0x3d6   :  { %1163 = vmatpush.bf16.msrb.mxu0 %v1985_v4  ;;  %v2163_v4 = vld [vmem:[%s3377_s4 + $0x4] sm:$0xf0] }
 0x3d7   :  { %v1961_v6 = vor.u32 %v2163_v4, %v1960_v3 }
 0x3dc   :  { %1945 = vmatmul.msk.bf16.gmra.mxu3 %vm45_vm1, %v659_v12  ;;  %1948 = vmatmul.msk.bf16.gmra.mxu0 %vm45_vm1, %v659_v12  ;;  %v2188_v12 = vld [vmem:[%s3377_s4 + $0xd4] sm:$0xf] }
 0x3dd   :  { %v2069_v30 = vor.u32 %v2188_v12, %v2066_v27  ;;  %v2166_v12 = vld [vmem:[%s3377_s4 + $0x24] sm:$0xf]  ;;  %v2042_v27 = vld [vmem:[%s3377_s4 + $0xa8] sm:$0xf0] }
 0x3de   :  { %v2045_v37 = vor.u32 %v2182_v20, %v2042_v27 }
 0x3df   :  { %1200 = vmatpush.bf16.msrb.mxu3 %v2069_v30  ;;  %v2041_v30 = vor.u32 %v2183_v11, %v2040_v9  ;;  %v1962_v9 = vld [vmem:[%s3377_s4 + $0x8] sm:$0xf0] }
 0x3e3   :  { %1201 = vmatpush.bf16.msrb.mxu3 %v2061_v60 }
 0x3e7   :  { %1202 = vmatpush.bf16.msrb.mxu3 %v2053_v10 }
 0x3eb   :  { %1203 = vmatpush.bf16.msrb.mxu3 %v2045_v37 }
 0x3ec   :  { %1957 = vmatmul.msk.bf16.vlgmr.msra.gmra.mxu3 %vm45_vm1, %v2161_v13  ;;  %v2065_v13 = vor.u32 %v2189_v8, %v2064_v7  ;;  %v1976_v7 = vld [vmem:[%s3377_s4 + $0x20] sm:$0xf]  ;;  %v2167_v8 = vld [vmem:[%s3377_s4 + $0x24] sm:$0xf0] }
 0x3ed   :  { %v1977_v29 = vor.u32 %v2167_v8, %v1976_v7  ;;  %v2179_v7 = vld [vmem:[%s3377_s4 + $0x84] sm:$0xf0]  ;;  %v2162_v8 = vld [vmem:[%s3377_s4 + $0x4] sm:$0xf] }
 0x3ee   :  { %1174 = vmatpush.bf16.msrb.mxu1 %v2065_v13  ;;  %v1978_v13 = vld [vmem:[%s3377_s4 + $0x28] sm:$0xf0]  ;;  %v1965_v11 = vor.u32 %v2162_v8, %v1962_v9 }
 0x3ef   :  { %v1981_v31 = vor.u32 %v2166_v12, %v1978_v13  ;;  %1164 = vmatpush.bf16.msrb.mxu0 %v1977_v29  ;;  %v2178_v12 = vld [vmem:[%s3377_s4 + $0x84] sm:$0xf]  ;;  %v2026_v13 = vld [vmem:[%s3377_s4 + $0x88] sm:$0xf0] }
 0x3f0   :  { %v2029_v20 = vor.u32 %v2178_v12, %v2026_v13 }
 0x3f1   :  { %1190 = vmatpush.bf16.msrb.mxu2 %v1981_v31 }
 0x3f2   :  { %1175 = vmatpush.bf16.msrb.mxu1 %v2057_v45  ;;  %v2180_v45 = vld [vmem:[%s3377_s4 + $0x94] sm:$0xf] }
 0x3f3   :  { %v2037_v60 = vor.u32 %v2180_v45, %v2034_v52  ;;  %1165 = vmatpush.bf16.msrb.mxu0 %v1969_v55 }
 0x3f5   :  { %1204 = vmatpush.bf16.msrb.mxu3 %v2037_v60 }
 0x3f6   :  { %1176 = vmatpush.bf16.msrb.mxu1 %v2049_v5  ;;  %v2024_v5 = vld [vmem:[%s3377_s4 + $0x80] sm:$0xf] }
 0x3f7   :  { %v2025_v10 = vor.u32 %v2179_v7, %v2024_v5  ;;  %1166 = vmatpush.bf16.msrb.mxu0 %v1961_v6 }
 0x3f9   :  { %1205 = vmatpush.bf16.msrb.mxu3 %v2029_v20  ;;  %v1220_v20 = vld.sshfl [vmem:[#allocation1] sm:$0xff pattern:$0x73625140] }
 0x3fa   :  { %1177 = vmatpush.bf16.msrb.mxu1 %v2041_v30 }
 0x3fe   :  { %1178 = vmatpush.bf16.msrb.mxu1 %v2033_v56 }
 0x402   :  { %1179 = vmatpush.bf16.msrb.mxu1 %v2025_v10 }
 0x437   :  { %v2923_v30 = vpop.f32.mrf.mxu1 }
 0x439   :  { %v2919_v27 = vpop.f32.mrf.mxu0 }
 0x43d   :  { %v2927_v32 = vpop.f32.mrf.mxu2 }
 0x43f   :  { %v2708_v14 = vpop.f32.mrf.mxu3  ;;  %v891_v33 = vpop.f32.mrf.mxu1 }
 0x440   :  { %v1221_v33 = vld.sshfl [vmem:[#allocation1 + $0x8] sm:$0xff pattern:$0x73625140] }
 0x441   :  { %v2921_v29 = vpop.f32.mrf.mxu0 }
 0x445   :  { %v904_v37 = vpop.f32.mrf.mxu2 }
 0x447   :  { %v2710_v15 = vpop.f32.mrf.mxu3 }
 0x449   :  { %v2925_v31 = vpop.f32.mrf.mxu0 }
 0x44f   :  { %v2712_v18 = vpop.f32.mrf.mxu3 }
 0x451   :  { %v2929_v34 = vpop.f32.mrf.mxu0 }
 0x457   :  { %v2714_v19 = vpop.f32.mrf.mxu3 }
 0x45f   :  { %v2743_v23 = vpop.f32.mrf.mxu3 }
 0x467   :  { %v696_v24 = vpop.f32.mrf.mxu3 }
 0x468   :  { %v2164_v24 = vld [vmem:[%s3377_s4 + $0x14] sm:$0xf] }
 0x469   :  { %v1973_v59 = vor.u32 %v2164_v24, %v1970_v41 }
 0x46b   :  { %1191 = vmatpush.bf16.msrb.mxu2 %v1973_v59  ;;  %v2934_v59 = vpop.f32.mrf.mxu0 }
 0x46f   :  { %v2867_v28 = vpop.f32.mrf.mxu3  ;;  %1192 = vmatpush.bf16.msrb.mxu2 %v1965_v11 }
 0x470   :  { %v948_v62 = vrot.slane %v2867_v28, 4 }
 0x473   :  { %v719_v60 = vpop.f32.mrf.mxu0 }
 0x474   :  { %v1230_v60 = vld [vmem:[%s3380_s6 + $0x10] sm:$0x3] }
 0x477   :  { %v944_v61 = vpop.f32.mrf.mxu3 }
 0x478   :  { %v953_v63 = vrot.slane %v944_v61, 4 }
 0x47a   :  { %v2215_v2 = vpack.i.bf16 %v953_v63, %v948_v62 }
 0x47c   :  { %2216 = vrot.lane.b32.xlu0 %v2215_v2, %s2228_s29  ;;  %v997_v2 = vpop.permute.xlu2 %996 }
 0x4ee   :  { %v2217_v38 = vpop.permute.xlu0 %2216 }
 0x4ef   :  { %v2219_v24 = vunpack.i.h.bf16 %v2217_v38  ;;  %v2218_v41 = vunpack.i.l.bf16 %v2217_v38 }
 0x4f1   :  { %v958_v45 = vsel %vm77_vm2, %v944_v61, %v2219_v24  ;;  %v957_v52 = vsel %vm77_vm2, %v2867_v28, %v2218_v41 }
 0x4f2   :  { %v960_v55 = vpack.c.bf16 %v958_v45, %v958_v45  ;;  %v959_v56 = vpack.c.bf16 %v957_v52, %v957_v52 }
 0x4f4   :  { %1167 = vmatmul.bf16.vlgmr.msrb.gmra.mxu0 %v959_v56  ;;  %1180 = vmatmul.bf16.vlgmr.msrb.gmra.mxu1 %v960_v55 }
 0x4f5   :  { %1193 = vmatmul.bf16.vlgmr.msrb.gmra.mxu2 %v959_v56  ;;  %1206 = vmatmul.bf16.vlgmr.msrb.gmra.mxu3 %v960_v55  ;;  %v2194_v55 = vld [vmem:[%s3380_s6] sm:$0xff]  ;;  %v2195_v56 = vld [vmem:[%s3380_s6 + $0x8] sm:$0xff] }
 0x571   :  { %v1168_v62 = vpop.f32.mrf.mxu0  ;;  %v1181_v63 = vpop.f32.mrf.mxu1 }
 0x572   :  { %v1169_v3 = vadd.f32 %v1168_v62, %v997_v2  ;;  %v1240_v62 = vunpack.c.l.b16 %v1230_v60 }
 0x574   :  { %v1182_v8 = vadd.f32 %v1181_v63, %v1169_v3  ;;  %v1243_v63 = vpack.c.b16 %v1240_v62, %v1240_v62 }
 0x578   :  { %v1194_v4 = vpop.f32.mrf.mxu2  ;;  %v1207_v5 = vpop.f32.mrf.mxu3 }
 0x579   :  { %v1195_v6 = vadd.f32 %v1194_v4, %v997_v2  ;;  %v1170_v61 = vpop.f32.mrf.mxu0  ;;  %v1183_v7 = vpop.f32.mrf.mxu1 }
 0x57b   :  { %v1208_v28 = vadd.f32 %v1207_v5, %v1195_v6 }
 0x57d   :  { %v1211_v9 = vpack.c.bf16 %v1208_v28, %v1182_v8 }
 0x57f   :  { %v1213_v10 = vunpack.c.l.b16 %v1211_v9  ;;  %v1214_v11 = vunpack.c.h.b16 %v1211_v9 }
 0x580   :  { %v1196_v12 = vpop.f32.mrf.mxu2  ;;  %v1209_v13 = vpop.f32.mrf.mxu3 }
 0x581   :  { %v1215_v37 = vpack.c.b16 %v1213_v10, %v1213_v10  ;;  %v1216_v38 = vpack.c.b16 %v1214_v11, %v1214_v11 }
 0x583   :  { %v1223_v24 = vsel %vm49_vm0, %v1215_v37, %v1220_v20  ;;  %v1225_v41 = vsel %vm49_vm0, %v1216_v38, %v1221_v33 }
 0x584   :  { %v1253_v45 = vsel %vm375_vm3, %v1223_v24, 0  ;;  %v1255_v52 = vsel %vm375_vm3, %v1225_v41, 0  ;;  %v733_v41 = vrot.slane %v2708_v14, 4 }
 0x585   :  { %1264 = vmatpush.bf16.msra.mxu0 %v1253_v45  ;;  %1287 = vmatpush.bf16.msra.mxu1 %v1255_v52 }
 0x588   :  { %2094 = vmatmul.msk.bf16.vlgmr.msra.gmra.mxu0 %vm365_vm4, %v2194_v55  ;;  %2097 = vmatmul.msk.bf16.vlgmr.msra.gmra.mxu1 %vm365_vm4, %v2194_v55  ;;  %v803_v55 = vrot.slane %v2714_v19, 4 }
 0x589   :  { %1747 = vmatpush.bf16.msrb.mxu0 %v1253_v45 }
 0x58d   :  { %1760 = vmatpush.bf16.msra.mxu0 %v1255_v52  ;;  %v760_v52 = vrot.slane %v2921_v29, 4 }
 0x598   :  { %2098 = vmatmul.msk.bf16.gmra.mxu1 %vm365_vm4, %v2195_v56  ;;  %2095 = vmatmul.msk.bf16.gmra.mxu0 %vm365_vm4, %v2195_v56 }
 0x5a8   :  { %2099 = vmatmul.msk.bf16.gmra.mxu1 %vm365_vm4, %v1243_v63  ;;  %2096 = vmatmul.msk.bf16.gmra.mxu0 %vm365_vm4, %v1243_v63 }
 0x605   :  { %v1266_v2 = vpop.f32.mrf.mxu0  ;;  %v1289_v3 = vpop.f32.mrf.mxu1 }
 0x606   :  { %1305 = vrot.lane.b32.xlu2 %v1289_v3, %s2230_s18  ;;  %1303 = vrot.lane.b32.xlu0 %v1266_v2, %s2230_s18  ;;  %v1322_v4 = vrot.slane %v1289_v3, 4  ;;  %v1321_v5 = vrot.slane %v1266_v2, 4 }
 0x60d   :  { %v1268_v6 = vpop.f32.mrf.mxu0  ;;  %v1291_v61 = vpop.f32.mrf.mxu1 }
 0x60e   :  { %1327 = vrot.lane.b32.xlu2 %v1322_v4, %s2231_s19  ;;  %1325 = vrot.lane.b32.xlu0 %v1321_v5, %s2231_s19  ;;  %v1359_v9 = vrot.slane %v1268_v6, 4  ;;  %v1360_v10 = vrot.slane %v1291_v61, 4 }
 0x615   :  { %v2959_v7 = vpop.f32.mrf.mxu1  ;;  %v2961_v8 = vpop.f32.mrf.mxu0 }
 0x616   :  { %1343 = vrot.lane.b32.xlu2 %v1291_v61, %s2233_s21  ;;  %1341 = vrot.lane.b32.xlu0 %v1268_v6, %s2233_s21  ;;  %v1383_v28 = vrot.slane %v2961_v8, 4  ;;  %v1384_v13 = vrot.slane %v2959_v7, 4  ;;  %v2992_v6 = vld [vmem:[%s3381_s5 + $0x2] sm:$0x3]  ;;  %v2997_v61 = vld [vmem:[%s3381_s5] sm:$0x3] }
 0x618   :  { %1387 = vrot.lane.b32.xlu1 %v1383_v28, %s2234_s22  ;;  %v3002_v28 = vld [vmem:[%s3381_s5 + $0x4] sm:$0x3] }
 0x61d   :  { %v1296_v11 = vpop.f32.mrf.mxu1  ;;  %v1273_v12 = vpop.f32.mrf.mxu0 }
 0x61e   :  { %1365 = vrot.lane.b32.xlu2 %v1360_v10, %s2232_s20  ;;  %1363 = vrot.lane.b32.xlu0 %v1359_v9, %s2232_s20  ;;  %v1421_v37 = vrot.slane %v1273_v12, 4  ;;  %v1422_v45 = vrot.slane %v1296_v11, 4  ;;  %v3389_v9 = vperm.slane %v2992_v6, 0  ;;  %v3388_v10 = vperm.slane %v2992_v6, 1 }
 0x625   :  { %v1299_v20 = vpop.f32.mrf.mxu1  ;;  %v1276_v33 = vpop.f32.mrf.mxu0 }
 0x626   :  { %1389 = vrot.lane.b32.xlu0 %v1384_v13, %s2234_s22  ;;  %1443 = vrot.lane.b32.xlu1 %v1299_v20, %s2237_s25  ;;  %v3013_v13 = vld [vmem:[%s3381_s5 + $0x6] sm:$0x3]  ;;  %v3402_v20 = vperm.slane %v2997_v61, 0 }
 0x627   :  { %1403 = vrot.lane.b32.xlu2 %v1273_v12, %s2235_s23  ;;  %v3394_v51 = vperm.slane %v3013_v13, 0  ;;  %v3393_v46 = vperm.slane %v3013_v13, 1 }
 0x62d   :  { %v1301_v38 = vpop.f32.mrf.mxu1  ;;  %v1278_v24 = vpop.f32.mrf.mxu0 }
 0x62e   :  { %1405 = vrot.lane.b32.xlu0 %v1296_v11, %s2235_s23  ;;  %721 = vrot.lane.b32.xlu1 %v2708_v14, %s2230_s18  ;;  %v3395_v38 = vperm.slane %v3002_v28, 1 }
 0x62f   :  { %1425 = vrot.lane.b32.xlu2 %v1421_v37, %s2236_s24  ;;  %v3396_v37 = vperm.slane %v3002_v28, 0 }
 0x636   :  { %1427 = vrot.lane.b32.xlu0 %v1422_v45, %s2236_s24  ;;  %737 = vrot.lane.b32.xlu1 %v733_v41, %s2231_s19 }
 0x637   :  { %1441 = vrot.lane.b32.xlu2 %v1276_v33, %s2237_s25  ;;  %v3397_v33 = vperm.slane %v2997_v61, 1 }
 0x63e   :  { %747 = vrot.lane.b32.xlu1 %v2710_v15, %s2233_s21 }
 0x646   :  { %765 = vrot.lane.b32.xlu1 %v760_v52, %s2232_s20 }
 0x64e   :  { %793 = vrot.lane.b32.xlu1 %v2929_v34, %s2235_s23 }
 0x656   :  { %807 = vrot.lane.b32.xlu1 %v803_v55, %s2236_s24 }
 0x660   :  { %v1306_v14 = vpop.permute.xlu2 %1305 }
 0x668   :  { %v1328_v56 = vpop.permute.xlu2 %1327 }
 0x670   :  { %v1344_v62 = vpop.permute.xlu2 %1343 }
 0x678   :  { %v1304_v60 = vpop.permute.xlu0 %1303  ;;  %v1366_v3 = vpop.permute.xlu2 %1365 }
 0x679   :  { %v1307_v24 = vsel %vm432_vm5, %v1304_v60, %v1306_v14  ;;  %v1308_v41 = vsel %vm432_vm5, %v1306_v14, %v1304_v60 }
 0x680   :  { %v1326_v63 = vpop.permute.xlu0 %1325 }
 0x681   :  { %v1404_v5 = vpop.permute.xlu2 %1403  ;;  %v1329_v11 = vsel %vm455_vm6, %v1326_v63, %v1328_v56  ;;  %v1330_v12 = vsel %vm455_vm6, %v1328_v56, %v1326_v63 }
 0x682   :  { %v1337_v56 = vmul.f32 %v3389_v9, %v1330_v12  ;;  %v1338_v63 = vmul.f32 %v3388_v10, %v1329_v11 }
 0x688   :  { %v1342_v2 = vpop.permute.xlu0 %1341 }
 0x689   :  { %v1345_v45 = vsel %vm473_vm7, %v1342_v2, %v1344_v62  ;;  %v1346_v52 = vsel %vm473_vm7, %v1344_v62, %v1342_v2  ;;  %v1315_v62 = vmul.f32 %v3402_v20, %v1308_v41  ;;  %v1316_v2 = vmul.f32 %v3397_v33, %v1307_v24  ;;  %v1426_v10 = vpop.permute.xlu2 %1425 }
 0x68a   :  { %v1353_v12 = vmul.f32 %v3396_v37, %v1346_v52  ;;  %v1354_v11 = vmul.f32 %v3395_v38, %v1345_v45  ;;  %v1388_v9 = vpop.permute.xlu1 %1387  ;;  %v3057_v45 = vld [vmem:[%s3381_s5 + $0xc] sm:$0x3] }
 0x68b   :  { %v1339_v40 = vadd.f32 %v1337_v56, %v1315_v62  ;;  %v1340_v39 = vadd.f32 %v1338_v63, %v1316_v2 }
 0x68d   :  { %v1355_v24 = vadd.f32 %v1353_v12, %v1339_v40  ;;  %v1356_v41 = vadd.f32 %v1354_v11, %v1340_v39  ;;  %v3068_v39 = vld [vmem:[%s3381_s5 + $0xe] sm:$0x3]  ;;  %v3401_v40 = vperm.slane %v3057_v45, 0  ;;  %v3400_v12 = vperm.slane %v3057_v45, 1 }
 0x690   :  { %v1364_v4 = vpop.permute.xlu0 %1363 }
 0x691   :  { %v1367_v14 = vsel %vm497_vm8, %v1364_v4, %v1366_v3  ;;  %v1368_v60 = vsel %vm497_vm8, %v1366_v3, %v1364_v4  ;;  %v3052_v4 = vld [vmem:[%s3381_s5 + $0xa] sm:$0x3] }
 0x692   :  { %v1375_v26 = vmul.f32 %v3394_v51, %v1368_v60  ;;  %v1376_v3 = vmul.f32 %v3393_v46, %v1367_v14  ;;  %v3399_v52 = vperm.slane %v3052_v4, 0  ;;  %v3398_v56 = vperm.slane %v3052_v4, 1 }
 0x693   :  { %v1434_v46 = vperm.slane %v3068_v39, 1 }
 0x694   :  { %v1377_v60 = vadd.f32 %v1375_v26, %v1355_v24  ;;  %v1378_v62 = vadd.f32 %v1376_v3, %v1356_v41  ;;  %v3075_v26 = vld [vmem:[%s3381_s5 + $0x10] sm:$0x3]  ;;  %v1433_v41 = vperm.slane %v3068_v39, 0 }
 0x695   :  { %v1449_v33 = vperm.slane %v3075_v26, 0 }
 0x696   :  { %v1380_v51 = vadd.f32 %v1378_v62, %v2959_v7  ;;  %v1379_v38 = vadd.f32 %v1377_v60, %v2961_v8 }
 0x698   :  { %v1390_v55 = vpop.permute.xlu0 %1389  ;;  %v1444_v37 = vpop.permute.xlu1 %1443 }
 0x699   :  { %v1391_v14 = vsel %vm523_vm9, %v1388_v9, %v1390_v55  ;;  %v1392_v2 = vsel %vm523_vm9, %v1390_v55, %v1388_v9  ;;  %v1442_v55 = vpop.permute.xlu2 %1441 }
 0x69a   :  { %v1399_v3 = vmul.f32 %v3399_v52, %v1391_v14  ;;  %v1400_v24 = vmul.f32 %v3398_v56, %v1392_v2  ;;  %v1445_v2 = vsel %vm583_vm12, %v1442_v55, %v1444_v37  ;;  %v1446_v56 = vsel %vm583_vm12, %v1444_v37, %v1442_v55 }
 0x69c   :  { %v1401_v7 = vadd.f32 %v1399_v3, %v1379_v38  ;;  %v1402_v62 = vadd.f32 %v1400_v24, %v1380_v51 }
 0x6a0   :  { %v1406_v63 = vpop.permute.xlu0 %1405 }
 0x6a1   :  { %v1407_v11 = vsel %vm541_vm10, %v1404_v5, %v1406_v63  ;;  %v1408_v9 = vsel %vm541_vm10, %v1406_v63, %v1404_v5  ;;  %v1450_v5 = vperm.slane %v3075_v26, 1 }
 0x6a2   :  { %v1415_v63 = vmul.f32 %v3401_v40, %v1407_v11  ;;  %v1416_v14 = vmul.f32 %v3400_v12, %v1408_v9  ;;  %v1453_v11 = vmul.f32 %v1449_v33, %v1445_v2 }
 0x6a3   :  { %v1454_v9 = vmul.f32 %v1450_v5, %v1446_v56 }
 0x6a4   :  { %v1417_v12 = vadd.f32 %v1415_v63, %v1401_v7  ;;  %v1418_v40 = vadd.f32 %v1416_v14, %v1402_v62  ;;  %v777_v14 = vrot.slane %v2712_v18, 4 }
 0x6a8   :  { %v1428_v8 = vpop.permute.xlu0 %1427 }
 0x6a9   :  { %v1429_v60 = vsel %vm565_vm11, %v1426_v10, %v1428_v8  ;;  %v1430_v52 = vsel %vm565_vm11, %v1428_v8, %v1426_v10 }
 0x6aa   :  { %v1437_v37 = vmul.f32 %v1433_v41, %v1429_v60  ;;  %v1438_v51 = vmul.f32 %v1434_v46, %v1430_v52  ;;  %v804_v52 = vrot.slane %v2929_v34, 4 }
 0x6ac   :  { %v1439_v38 = vadd.f32 %v1437_v37, %v1417_v12  ;;  %v1440_v55 = vadd.f32 %v1438_v51, %v1418_v40 }
 0x6ae   :  { %v1455_v3 = vadd.f32 %v1453_v11, %v1439_v38  ;;  %v1456_v24 = vadd.f32 %v1454_v9, %v1440_v55 }
 0x6b0   :  { %v1457_v20 = vmul.f32 %v1455_v3, %v1455_v3  ;;  %v1458_v10 = vmul.f32 %v1456_v24, %v1456_v24 }
 0x6b2   :  { %v1461_v8 = vrot.slane %v1457_v20, 4  ;;  %v1462_v25 = vrot.slane %v1458_v10, 4  ;;  %v759_v10 = vrot.slane %v2710_v15, 4 }
 0x6b4   :  { %v1465_v2 = vsel %vm375_vm3, %v1455_v3, %v1461_v8  ;;  %v1466_v56 = vsel %vm375_vm3, %v1456_v24, %v1462_v25  ;;  %v778_v8 = vrot.slane %v2925_v31, 4 }
 0x6b5   :  { %v1467_v63 = vadd.f32 %v1466_v56, %v1465_v2 }
 0x6b7   :  { %1468 = vadd.xlane.f32.xlu0 %v1467_v63 }
 0x6cb   :  { %781 = vrot.lane.b32.xlu0 %v777_v14, %s2234_s22 }
 0x6d3   :  { %809 = vrot.lane.b32.xlu0 %v804_v52, %s2236_s24 }
 0x6db   :  { %817 = vrot.lane.b32.xlu0 %v2743_v23, %s2237_s25  ;;  %v734_v23 = vrot.slane %v2919_v27, 4 }
 0x72a   :  { %v1469_v40 = vpop.xlane.xlu0 %1468 }
 0x72b   :  { %v1470_v20 = vmul.f32 0.00390625, %v1469_v40 }
 0x72d   :  { %v1471_v12 = vmul.f32 %v1470_v20, %v1470_v20  ;;  %v1477_v56 = vsub.f32 %v1455_v3, %v1470_v20  ;;  %v1478_v63 = vsub.f32 %v1456_v24, %v1470_v20 }
 0x72f   :  { %v1473_v7 = vrot.slane %v1471_v12, 4 }
 0x731   :  { %v1475_v62 = vsub.f32 %v1470_v20, %v1473_v7 }
 0x733   :  { %v1476_v60 = vmax.f32 %v1475_v62, 0.0 }
 0x735   :  { %v1479_v25 = vadd.f32 1e-05, %v1476_v60 }
 0x737   :  { %2222 = vrsqrt.f32 %v1479_v25  ;;  %vm1486_vm13 = vweird.f32 %v1479_v25 }
 0x73d   :  { %v2223_v11 = vpop.eup %2222 }
 0x73e   :  { %v1481_v9 = vmul.f32 %v2223_v11, %v1479_v25  ;;  %vm1487_vm2 = vweird.f32 %v2223_v11 }
 0x73f   :  { %vm1488_vm14 = vmor %vm1486_vm13, %vm1487_vm2 }
 0x740   :  { %v1482_v37 = vmul.f32 %v2223_v11, %v1481_v9 }
 0x742   :  { %v1483_v51 = vmul.f32 0.5, %v1482_v37 }
 0x744   :  { %v1484_v38 = vsub.f32 1.5, %v1483_v51 }
 0x746   :  { %v1485_v34 = vmul.f32 %v2223_v11, %v1484_v38 }
 0x748   :  { %v1489_v55 = vsel %vm1488_vm14, %v2223_v11, %v1485_v34 }
 0x749   :  { %1492 = vperm.xlu2 %2214, %v1489_v55  }
 0x751   :  { %723 = vrot.lane.b32.xlu2 %v2919_v27, %s2230_s18 }
 0x759   :  { %739 = vrot.lane.b32.xlu2 %v734_v23, %s2231_s19 }
 0x761   :  { %749 = vrot.lane.b32.xlu2 %v2921_v29, %s2233_s21  ;;  %v722_v29 = vpop.permute.xlu1 %721 }
 0x769   :  { %763 = vrot.lane.b32.xlu2 %v759_v10, %s2232_s20  ;;  %v738_v20 = vpop.permute.xlu1 %737 }
 0x771   :  { %783 = vrot.lane.b32.xlu2 %v778_v8, %s2234_s22  ;;  %v2197_v8 = vld [vmem:[%s3382_s7 + $0x8] sm:$0xff] }
 0x779   :  { %791 = vrot.lane.b32.xlu2 %v2714_v19, %s2235_s23  ;;  %v2196_v19 = vld [vmem:[%s3382_s7] sm:$0xff] }
 0x7a3   :  { %v1493_v2 = vpop.permute.xlu2 %1492 }
 0x7a4   :  { %v1494_v27 = vrot.slane %v1493_v2, 4 }
 0x7a6   :  { %v1496_v14 = vmul.f32 %v1494_v27, %v1477_v56  ;;  %v1497_v52 = vmul.f32 %v1494_v27, %v1478_v63 }
 0x7a8   :  { %v1498_v40 = vmax.f32 %v1496_v14, 0.0  ;;  %v1499_v12 = vmax.f32 %v1497_v52, 0.0 }
 0x7aa   :  { %v1505_v7 = vpack.c.bf16 %v1498_v40, %v1498_v40  ;;  %v1506_v15 = vpack.c.bf16 %v1499_v12, %v1499_v12 }
 0x7ab   :  { %v724_v62 = vpop.permute.xlu2 %723 }
 0x7ac   :  { %v1530_v60 = vsel %vm49_vm0, %v1505_v7, 0  ;;  %v1533_v25 = vsel %vm49_vm0, %v1506_v15, 0  ;;  %v725_v3 = vsel %vm432_vm5, %v722_v29, %v724_v62  ;;  %v726_v24 = vsel %vm432_vm5, %v724_v62, %v722_v29 }
 0x7ad   :  { %1542 = vmatpush.bf16.msra.mxu2 %v1530_v60  ;;  %1565 = vmatpush.bf16.msra.mxu3 %v1533_v25  ;;  %v727_v51 = vmul.f32 %v726_v24, %v437_v48  ;;  %v728_v38 = vmul.f32 %v725_v3, %v438_v49  ;;  %v1516_v48 = vunpack.c.l.b16 %v1504_v43 }
 0x7af   :  { %v1519_v49 = vpack.c.b16 %v1516_v48, %v1516_v48  ;;  %v782_v48 = vpop.permute.xlu0 %781 }
 0x7b0   :  { %2115 = vmatmul.msk.bf16.vlgmr.msra.gmra.mxu2 %vm45_vm1, %v2196_v19  ;;  %2118 = vmatmul.msk.bf16.vlgmr.msra.gmra.mxu3 %vm45_vm1, %v2196_v19 }
 0x7b3   :  { %v740_v11 = vpop.permute.xlu2 %739 }
 0x7b4   :  { %v741_v9 = vsel %vm455_vm6, %v738_v20, %v740_v11  ;;  %v742_v37 = vsel %vm455_vm6, %v740_v11, %v738_v20 }
 0x7b5   :  { %v743_v34 = vmul.f32 %v742_v37, %v461_v50  ;;  %v744_v55 = vmul.f32 %v741_v9, %v462_v54  ;;  %v748_v37 = vpop.permute.xlu1 %747 }
 0x7b7   :  { %v3154_v23 = vadd.f32 %v743_v34, %v727_v51  ;;  %v3156_v10 = vadd.f32 %v744_v55, %v728_v38 }
 0x7bb   :  { %v750_v20 = vpop.permute.xlu2 %749 }
 0x7bd   :  { %v766_v38 = vpop.permute.xlu1 %765 }
 0x7c0   :  { %2119 = vmatmul.msk.bf16.gmra.mxu3 %vm45_vm1, %v2197_v8  ;;  %2116 = vmatmul.msk.bf16.gmra.mxu2 %vm45_vm1, %v2197_v8 }
 0x7c3   :  { %v764_v11 = vpop.permute.xlu2 %763 }
 0x7c5   :  { %v794_v55 = vpop.permute.xlu1 %793 }
 0x7cb   :  { %v784_v9 = vpop.permute.xlu2 %783 }
 0x7cc   :  { %v786_v47 = vsel %vm523_vm9, %v784_v9, %v782_v48 }
 0x7cd   :  { %v808_v43 = vpop.permute.xlu1 %807 }
 0x7d0   :  { %2117 = vmatmul.msk.bf16.gmra.mxu2 %vm45_vm1, %v1519_v49  ;;  %2120 = vmatmul.msk.bf16.gmra.mxu3 %vm45_vm1, %v1519_v49 }
 0x7d3   :  { %v792_v51 = vpop.permute.xlu2 %791 }
 0x833   :  { %v1544_v44 = vpop.f32.mrf.mxu2  ;;  %v1567_v50 = vpop.f32.mrf.mxu3 }
 0x834   :  { %1583 = vrot.lane.b32.xlu2 %v1567_v50, %s2230_s18  ;;  %1581 = vrot.lane.b32.xlu1 %v1544_v44, %s2230_s18  ;;  %v1594_v54 = vrot.slane %v1567_v50, 4  ;;  %v1593_v2 = vrot.slane %v1544_v44, 4  ;;  %v751_v44 = vsel %vm473_vm7, %v748_v37, %v750_v20  ;;  %v767_v50 = vsel %vm497_vm8, %v764_v11, %v766_v38 }
 0x83b   :  { %v1569_v56 = vpop.f32.mrf.mxu3  ;;  %v1546_v63 = vpop.f32.mrf.mxu2 }
 0x83c   :  { %1599 = vrot.lane.b32.xlu2 %v1594_v54, %s2231_s19  ;;  %1597 = vrot.lane.b32.xlu1 %v1593_v2, %s2231_s19  ;;  %v1619_v27 = vrot.slane %v1546_v63, 4  ;;  %v1620_v12 = vrot.slane %v1569_v56, 4  ;;  %v768_v54 = vsel %vm497_vm8, %v766_v38, %v764_v11 }
 0x83d   :  { %1607 = vrot.lane.b32.xlu0 %v1546_v63, %s2233_s21 }
 0x843   :  { %v3173_v14 = vpop.f32.mrf.mxu3  ;;  %v3175_v52 = vpop.f32.mrf.mxu2 }
 0x844   :  { %v1638_v40 = vrot.slane %v3173_v14, 4  ;;  %1609 = vrot.lane.b32.xlu1 %v1569_v56, %s2233_s21  ;;  %1623 = vrot.lane.b32.xlu2 %v1619_v27, %s2232_s20  ;;  %v1637_v15 = vrot.slane %v3175_v52, 4  ;;  %v754_v56 = vmul.f32 %v751_v44, %v480_v58 }
 0x846   :  { %1643 = vrot.lane.b32.xlu0 %v1638_v40, %s2234_s22  ;;  %v810_v40 = vpop.permute.xlu0 %809 }
 0x847   :  { %v811_v16 = vsel %vm565_vm11, %v808_v43, %v810_v40 }
 0x84b   :  { %v1574_v29 = vpop.f32.mrf.mxu3  ;;  %v1551_v7 = vpop.f32.mrf.mxu2 }
 0x84c   :  { %1625 = vrot.lane.b32.xlu1 %v1620_v12, %s2232_s20  ;;  %1653 = vrot.lane.b32.xlu2 %v1574_v29, %s2235_s23  ;;  %v1663_v62 = vrot.slane %v1551_v7, 4  ;;  %v1664_v19 = vrot.slane %v1574_v29, 4  ;;  %v769_v12 = vmul.f32 %v768_v54, %v503_v0  ;;  %v770_v29 = vmul.f32 %v767_v50, %v504_v1 }
 0x84d   :  { %v796_v0 = vsel %vm541_vm10, %v794_v55, %v792_v51  ;;  %v788_v1 = vmul.f32 %v786_v47, %v530_v22 }
 0x84e   :  { %1651 = vrot.lane.b32.xlu0 %v1551_v7, %s2235_s23 }
 0x853   :  { %v1554_v60 = vpop.f32.mrf.mxu2  ;;  %v1577_v25 = vpop.f32.mrf.mxu3 }
 0x854   :  { %1641 = vrot.lane.b32.xlu1 %v1637_v15, %s2234_s22  ;;  %1667 = vrot.lane.b32.xlu2 %v1663_v62, %s2236_s24  ;;  %v756_v15 = vadd.f32 %v754_v56, %v3156_v10 }
 0x856   :  { %1679 = vrot.lane.b32.xlu0 %v1577_v25, %s2237_s25  ;;  %v772_v62 = vadd.f32 %v770_v29, %v756_v15 }
 0x85b   :  { %v1556_v3 = vpop.f32.mrf.mxu2  ;;  %v1579_v24 = vpop.f32.mrf.mxu3 }
 0x85c   :  { %1669 = vrot.lane.b32.xlu1 %v1664_v19, %s2236_s24  ;;  %819 = vrot.lane.b32.xlu2 %v2934_v59, %s2237_s25  ;;  %v752_v59 = vsel %vm473_vm7, %v750_v20, %v748_v37  ;;  %v774_v19 = vadd.f32 %v772_v62, %v2925_v31  ;;  %v3404_v3 = vperm.slane %v2620_v17, 0  ;;  %v3405_v20 = vperm.slane %v2620_v17, 1 }
 0x85d   :  { %v753_v2 = vmul.f32 %v752_v59, %v479_v57  ;;  %v785_v57 = vsel %vm523_vm9, %v782_v48, %v784_v9  ;;  %v818_v9 = vpop.permute.xlu0 %817 }
 0x85e   :  { %v787_v53 = vmul.f32 %v785_v57, %v529_v21  ;;  %v798_v11 = vmul.f32 %v796_v0, %v3405_v20  ;;  %v812_v21 = vsel %vm565_vm11, %v810_v40, %v808_v43  ;;  %v3408_v43 = vperm.slane %v2646_v36, 0 }
 0x85f   :  { %v755_v7 = vadd.f32 %v753_v2, %v3154_v23  ;;  %v3409_v40 = vperm.slane %v2646_v36, 1 }
 0x861   :  { %v771_v58 = vadd.f32 %v769_v12, %v755_v7 }
 0x863   :  { %v773_v25 = vadd.f32 %v771_v58, %v2712_v18  ;;  %v3406_v18 = vperm.slane %v2641_v35, 0 }
 0x864   :  { %1677 = vrot.lane.b32.xlu1 %v1554_v60, %s2237_s25  ;;  %v795_v60 = vsel %vm541_vm10, %v792_v51, %v794_v55  ;;  %v790_v51 = vadd.f32 %v788_v1, %v774_v19  ;;  %v3407_v55 = vperm.slane %v2641_v35, 1 }
 0x865   :  { %v797_v24 = vmul.f32 %v795_v60, %v3404_v3  ;;  %v789_v37 = vadd.f32 %v787_v53, %v773_v25  ;;  %v813_v31 = vmul.f32 %v811_v16, %v3406_v18  ;;  %v3413_v16 = vperm.slane %v2997_v61, 1 }
 0x866   :  { %v800_v38 = vadd.f32 %v798_v11, %v790_v51  ;;  %v814_v48 = vmul.f32 %v812_v21, %v3407_v55  ;;  %v3410_v11 = vperm.slane %v2992_v6, 0 }
 0x867   :  { %v799_v22 = vadd.f32 %v797_v24, %v789_v37 }
 0x868   :  { %v816_v2 = vadd.f32 %v814_v48, %v800_v38 }
 0x869   :  { %v815_v54 = vadd.f32 %v813_v31, %v799_v22  ;;  %v3414_v22 = vperm.slane %v3002_v28, 0 }
 0x88e   :  { %v3192_v34 = vpop.permute.xlu2 %1583 }
 0x896   :  { %v1600_v8 = vpop.permute.xlu2 %1599 }
 0x89e   :  { %v3194_v49 = vpop.permute.xlu2 %1623 }
 0x8a6   :  { %v1582_v63 = vpop.permute.xlu1 %1581  ;;  %v3208_v27 = vpop.permute.xlu2 %1653 }
 0x8a7   :  { %v1585_v19 = vsel %vm432_vm5, %v1582_v63, %v3192_v34  ;;  %v1586_v3 = vsel %vm432_vm5, %v3192_v34, %v1582_v63  ;;  %v3412_v63 = vperm.slane %v2997_v61, 0 }
 0x8a8   :  { %v1588_v21 = vmul.f32 %v1585_v19, %v3413_v16 }
 0x8a9   :  { %v1587_v51 = vmul.f32 %v1586_v3, %v3412_v63 }
 0x8ae   :  { %v1598_v23 = vpop.permute.xlu1 %1597  ;;  %v3228_v10 = vpop.permute.xlu2 %1667 }
 0x8af   :  { %v1608_v29 = vpop.permute.xlu0 %1607  ;;  %v1601_v0 = vsel %vm455_vm6, %v1598_v23, %v1600_v8  ;;  %v1602_v53 = vsel %vm455_vm6, %v1600_v8, %v1598_v23  ;;  %v3411_v23 = vperm.slane %v2992_v6, 1  ;;  %v3415_v6 = vperm.slane %v3002_v28, 1 }
 0x8b0   :  { %v1603_v8 = vmul.f32 %v1602_v53, %v3410_v11  ;;  %v3421_v53 = vperm.slane %v3057_v45, 1 }
 0x8b2   :  { %v1605_v55 = vadd.f32 %v1603_v8, %v1587_v51 }
 0x8b6   :  { %v1610_v44 = vpop.permute.xlu1 %1609  ;;  %v820_v17 = vpop.permute.xlu2 %819 }
 0x8b7   :  { %v821_v59 = vsel %vm583_vm12, %v818_v9, %v820_v17  ;;  %v822_v50 = vsel %vm583_vm12, %v820_v17, %v818_v9  ;;  %v1611_v24 = vsel %vm473_vm7, %v1608_v29, %v1610_v44  ;;  %v1612_v20 = vsel %vm473_vm7, %v1610_v44, %v1608_v29 }
 0x8b8   :  { %v823_v56 = vmul.f32 %v821_v59, %v3408_v43  ;;  %v824_v12 = vmul.f32 %v822_v50, %v3409_v40  ;;  %v1644_v25 = vpop.permute.xlu0 %1643  ;;  %v1604_v9 = vmul.f32 %v1601_v0, %v3411_v23  ;;  %v1613_v38 = vmul.f32 %v1612_v20, %v3414_v22 }
 0x8b9   :  { %v1614_v18 = vmul.f32 %v1611_v24, %v3415_v6  ;;  %v3416_v44 = vperm.slane %v3013_v13, 0  ;;  %v3418_v40 = vperm.slane %v3052_v4, 0  ;;  %v3419_v29 = vperm.slane %v3052_v4, 1 }
 0x8ba   :  { %v3252_v7 = vadd.f32 %v823_v56, %v815_v54  ;;  %v3254_v35 = vadd.f32 %v824_v12, %v816_v2  ;;  %v1606_v48 = vadd.f32 %v1604_v9, %v1588_v21  ;;  %v1615_v50 = vadd.f32 %v1613_v38, %v1605_v55  ;;  %v1730_v21 = vld [vmem:[%s3383_s8] sm:$0x3] }
 0x8bb   :  { %2121 = vmatmul.msk.bf16.vlgmr.msrb.gmra.mxu0 %vm365_vm4, %v1730_v21 }
 0x8bc   :  { %v827_v15 = vmul.f32 %v3252_v7, %v3252_v7  ;;  %v828_v57 = vmul.f32 %v3254_v35, %v3254_v35  ;;  %v1616_v54 = vadd.f32 %v1614_v18, %v1606_v48 }
 0x8be   :  { %v1626_v47 = vpop.permute.xlu1 %1625  ;;  %v831_v58 = vrot.slane %v827_v15, 4  ;;  %v832_v62 = vrot.slane %v828_v57, 4 }
 0x8bf   :  { %v1627_v37 = vsel %vm497_vm8, %v3194_v49, %v1626_v47  ;;  %v1628_v34 = vsel %vm497_vm8, %v1626_v47, %v3194_v49  ;;  %v3417_v49 = vperm.slane %v3013_v13, 1 }
 0x8c0   :  { %v835_v60 = vsel %vm375_vm3, %v3252_v7, %v831_v58  ;;  %v836_v36 = vsel %vm375_vm3, %v3254_v35, %v832_v62  ;;  %v1629_v17 = vmul.f32 %v1628_v34, %v3416_v44  ;;  %v1652_v56 = vpop.permute.xlu0 %1651 }
 0x8c1   :  { %v837_v1 = vadd.f32 %v836_v36, %v835_v60  ;;  %v1630_v59 = vmul.f32 %v1627_v37, %v3417_v49  ;;  %v1655_v58 = vsel %vm541_vm10, %v1652_v56, %v3208_v27  ;;  %v1656_v62 = vsel %vm541_vm10, %v3208_v27, %v1652_v56 }
 0x8c2   :  { %v1631_v43 = vadd.f32 %v1629_v17, %v1615_v50 }
 0x8c3   :  { %838 = vadd.xlane.f32.xlu2 %v837_v1  ;;  %v1632_v28 = vadd.f32 %v1630_v59, %v1616_v54  ;;  %v1658_v1 = vmul.f32 %v1656_v62, %v3421_v53  ;;  %v1731_v62 = vld [vmem:[%s3384_s9] sm:$0xf] }
 0x8c4   :  { %v1633_v13 = vadd.f32 %v1631_v43, %v3175_v52 }
 0x8c5   :  { %v1634_v47 = vadd.f32 %v1632_v28, %v3173_v14  ;;  %v3420_v14 = vperm.slane %v3057_v45, 0 }
 0x8c6   :  { %v1642_v31 = vpop.permute.xlu1 %1641 }
 0x8c7   :  { %v1645_v61 = vsel %vm523_vm9, %v1642_v31, %v1644_v25  ;;  %v1646_v2 = vsel %vm523_vm9, %v1644_v25, %v1642_v31  ;;  %v1657_v0 = vmul.f32 %v1655_v58, %v3420_v14 }
 0x8c8   :  { %v1647_v12 = vmul.f32 %v1645_v61, %v3418_v40  ;;  %v1648_v15 = vmul.f32 %v1646_v2, %v3419_v29  ;;  %v1680_v19 = vpop.permute.xlu0 %1679  ;;  %v871_v2 = vld [vmem:[%s3384_s9] sm:$0xf] }
 0x8ca   :  { %v1649_v36 = vadd.f32 %v1647_v12, %v1633_v13  ;;  %v1650_v52 = vadd.f32 %v1648_v15, %v1634_v47 }
 0x8cb   :  { %2122 = vmatmul.msk.bf16.vlgmr.msra.gmra.mxu0 %vm365_vm4, %v1730_v21 }
 0x8cc   :  { %v1659_v3 = vadd.f32 %v1657_v0, %v1649_v36  ;;  %v1660_v24 = vadd.f32 %v1658_v1, %v1650_v52 }
 0x8ce   :  { %v1670_v57 = vpop.permute.xlu1 %1669 }
 0x8cf   :  { %v1671_v60 = vsel %vm565_vm11, %v3228_v10, %v1670_v57  ;;  %v1672_v4 = vsel %vm565_vm11, %v1670_v57, %v3228_v10 }
 0x8d0   :  { %v1673_v25 = vmul.f32 %v1671_v60, %v1433_v41  ;;  %v1674_v27 = vmul.f32 %v1672_v4, %v1434_v46 }
 0x8d2   :  { %v1675_v8 = vadd.f32 %v1673_v25, %v1659_v3  ;;  %v1676_v23 = vadd.f32 %v1674_v27, %v1660_v24 }
 0x8d6   :  { %v1678_v20 = vpop.permute.xlu1 %1677 }
 0x8d7   :  { %v1681_v10 = vsel %vm583_vm12, %v1678_v20, %v1680_v19  ;;  %v1682_v11 = vsel %vm583_vm12, %v1680_v19, %v1678_v20 }
 0x8d8   :  { %v1683_v45 = vmul.f32 %v1681_v10, %v1449_v33  ;;  %v1684_v41 = vmul.f32 %v1682_v11, %v1450_v5 }
 0x8da   :  { %v3338_v39 = vadd.f32 %v1683_v45, %v1675_v8  ;;  %v3340_v46 = vadd.f32 %v1684_v41, %v1676_v23 }
 0x8dc   :  { %v1687_v9 = vmul.f32 %v3338_v39, %v3338_v39  ;;  %v1688_v37 = vmul.f32 %v3340_v46, %v3340_v46 }
 0x8de   :  { %v1691_v42 = vrot.slane %v1687_v9, 4  ;;  %v1692_v34 = vrot.slane %v1688_v37, 4 }
 0x8e0   :  { %v1695_v63 = vsel %vm375_vm3, %v3338_v39, %v1691_v42  ;;  %v1696_v33 = vsel %vm375_vm3, %v3340_v46, %v1692_v34 }
 0x8e1   :  { %v1697_v26 = vadd.f32 %v1696_v33, %v1695_v63 }
 0x8e3   :  { %1698 = vadd.xlane.f32.xlu1 %v1697_v26 }
 0x936   :  { %v839_v5 = vpop.xlane.xlu2 %838 }
 0x937   :  { %v840_v51 = vmul.f32 0.00390625, %v839_v5 }
 0x938   :  { %v1749_v60 = vpop.f32.mrf.mxu0 }
 0x939   :  { %v841_v16 = vmul.f32 %v840_v51, %v840_v51  ;;  %v847_v0 = vsub.f32 %v3252_v7, %v840_v51  ;;  %v848_v53 = vsub.f32 %v3254_v35, %v840_v51 }
 0x93b   :  { %v843_v22 = vrot.slane %v841_v16, 4 }
 0x93d   :  { %v845_v38 = vsub.f32 %v840_v51, %v843_v22 }
 0x93f   :  { %v846_v6 = vmax.f32 %v845_v38, 0.0 }
 0x940   :  { %v1751_v4 = vpop.f32.mrf.mxu0 }
 0x941   :  { %v849_v18 = vadd.f32 1e-05, %v846_v6 }
 0x943   :  { %2224 = vrsqrt.f32 %v849_v18  ;;  %vm856_vm1 = vweird.f32 %v849_v18 }
 0x948   :  { %v1762_v14 = vpop.f32.mrf.mxu0 }
 0x949   :  { %v2225_v31 = vpop.eup %2224 }
 0x94a   :  { %v851_v55 = vmul.f32 %v2225_v31, %v849_v18  ;;  %vm857_vm0 = vweird.f32 %v2225_v31 }
 0x94b   :  { %vm858_vm5 = vmor %vm856_vm1, %vm857_vm0 }
 0x94c   :  { %v852_v48 = vmul.f32 %v2225_v31, %v851_v55 }
 0x94e   :  { %v853_v44 = vmul.f32 0.5, %v852_v48 }
 0x950   :  { %v854_v17 = vsub.f32 1.5, %v853_v44  ;;  %v1764_v10 = vpop.f32.mrf.mxu0 }
 0x952   :  { %v855_v49 = vmul.f32 %v2225_v31, %v854_v17 }
 0x954   :  { %v859_v59 = vsel %vm858_vm5, %v2225_v31, %v855_v49 }
 0x955   :  { %862 = vperm.xlu0 %2213, %v859_v59  }
 0x956   :  { %v1699_v50 = vpop.xlane.xlu1 %1698 }
 0x957   :  { %v1700_v54 = vmul.f32 0.00390625, %v1699_v50 }
 0x959   :  { %v1701_v61 = vmul.f32 %v1700_v54, %v1700_v54  ;;  %v1707_v37 = vsub.f32 %v3338_v39, %v1700_v54 }
 0x95b   :  { %v1703_v43 = vrot.slane %v1701_v61, 4 }
 0x95d   :  { %v1705_v28 = vsub.f32 %v1700_v54, %v1703_v43  ;;  %874 = vperm.xlu0 %2213, %v871_v2  }
 0x95f   :  { %v1706_v56 = vmax.f32 %v1705_v28, 0.0 }
 0x961   :  { %v1709_v40 = vadd.f32 1e-05, %v1706_v56 }
 0x963   :  { %2226 = vrsqrt.f32 %v1709_v40  ;;  %vm1716_vm6 = vweird.f32 %v1709_v40 }
 0x969   :  { %v2227_v12 = vpop.eup %2226 }
 0x96a   :  { %v1711_v29 = vmul.f32 %v2227_v12, %v1709_v40  ;;  %vm1717_vm4 = vweird.f32 %v2227_v12 }
 0x96b   :  { %vm1718_vm7 = vmor %vm1716_vm6, %vm1717_vm4 }
 0x96c   :  { %v1712_v15 = vmul.f32 %v2227_v12, %v1711_v29 }
 0x96e   :  { %v1713_v57 = vmul.f32 0.5, %v1712_v15 }
 0x970   :  { %v1714_v13 = vsub.f32 1.5, %v1713_v57 }
 0x972   :  { %v1715_v47 = vmul.f32 %v2227_v12, %v1714_v13 }
 0x974   :  { %v1719_v58 = vsel %vm1718_vm7, %v2227_v12, %v1715_v47 }
 0x975   :  { %1722 = vperm.xlu0 %2213, %v1719_v58  }
 0x97d   :  { %1734 = vperm.xlu0 %2213, %v1731_v62  }
 0x9c7   :  { %v863_v36 = vpop.permute.xlu0 %862 }
 0x9c8   :  { %v864_v52 = vrot.slane %v863_v36, 4 }
 0x9ca   :  { %v866_v1 = vmul.f32 %v864_v52, %v847_v0  ;;  %v867_v25 = vmul.f32 %v864_v52, %v848_v53 }
 0x9cc   :  { %v868_v19 = vmax.f32 %v866_v1, 0.0  ;;  %v869_v3 = vmax.f32 %v867_v25, 0.0 }
 0x9cf   :  { %v875_v27 = vpop.permute.xlu0 %874 }
 0x9d0   :  { %v890_v24 = vadd.f32 %v2923_v30, %v875_v27  ;;  %v903_v20 = vadd.f32 %v2927_v32, %v875_v27  ;;  %v1708_v30 = vsub.f32 %v3340_v46, %v1700_v54 }
 0x9d2   :  { %v906_v11 = vadd.f32 %v890_v24, %v868_v19  ;;  %v907_v8 = vadd.f32 %v903_v20, %v869_v3 }
 0x9d4   :  { %v909_v23 = vmax.f32 %v907_v8, 0.0  ;;  %v908_v45 = vmax.f32 %v906_v11, 0.0 }
 0x9d6   :  { %v912_v41 = vrot.slane %v909_v23, 4 }
 0x9d8   :  { %v913_v9 = vsel %vm375_vm3, %v908_v45, %v912_v41 }
 0x9d9   :  { %915 = vst [vmem:[%s3385_s10] sm:$0xff] %v913_v9 }
 0x9e7   :  { %v1723_v7 = vpop.permute.xlu0 %1722 }
 0x9e8   :  { %v1724_v35 = vrot.slane %v1723_v7, 4 }
 0x9ea   :  { %v1726_v42 = vmul.f32 %v1724_v35, %v1707_v37  ;;  %v1727_v32 = vmul.f32 %v1724_v35, %v1708_v30 }
 0x9ec   :  { %v1728_v63 = vmax.f32 %v1726_v42, 0.0  ;;  %v1729_v33 = vmax.f32 %v1727_v32, 0.0 }
 0x9ef   :  { %v1735_v34 = vpop.permute.xlu0 %1734 }
 0x9f0   :  { %v1750_v26 = vadd.f32 %v1749_v60, %v1735_v34  ;;  %v1763_v5 = vadd.f32 %v1762_v14, %v1735_v34 }
 0x9f2   :  { %v1766_v51 = vadd.f32 %v1750_v26, %v1728_v63  ;;  %v1767_v16 = vadd.f32 %v1763_v5, %v1729_v33 }
 0x9f4   :  { %v1769_v21 = vmax.f32 %v1767_v16, 0.0  ;;  %v1768_v22 = vmax.f32 %v1766_v51, 0.0 }
 0x9f6   :  { %v1772_v38 = vrot.slane %v1769_v21, 4 }
 0x9f8   :  { %v1773_v6 = vsel %vm375_vm3, %v1768_v22, %v1772_v38 }
 0x9f9   :  { %2123 = vst [vmem:[%s3385_s10 + $0x8] sm:$0xff] %v1773_v6 }

</bundles_post_ra>
